<compile_context>
chip_gen: v7x
topology: tpu7x:2x2x1
jax: 0.10.0
libtpu: 0.0.40
codegen_flags: <defaults>
</compile_context>

<pallas_src>
import functools

import jax
import jax.numpy as jnp
from jax.experimental import pallas as pl
from jax.experimental.pallas import tpu as pltpu


# ----------------------------- tiling constants -----------------------------
_LANE = 128                  # feature dims padded to full lane width
_TM = 256                    # aggregation row tile
_TK = 512                    # aggregation reduction tile over A_hat columns
_TM_PROJ = 512               # projection row tile
_N_ALIGN_TILED = 512         # lcm(_TM, _TK, _TM_PROJ): tiles always divide n_pad


def _round_up(x, m):
    return ((x + m - 1) // m) * m


def _pad2(arr, rows, cols):
    return jnp.pad(arr, ((0, rows - arr.shape[0]), (0, cols - arr.shape[1])))


def _vmem_budget_bytes():
    """Per-generation VMEM budget (~72% of physical per-core VMEM).

    v5e/v6e: 128 MiB physical -> ~92 MiB budget;  v7x: 64 MiB/TC -> ~46 MiB.
    """
    phys = 64 * 1024 * 1024
    try:
        phys = int(pltpu.get_tpu_info().vmem_capacity_bytes)
    except Exception:
        pass  # fall back to the most conservative (v7x-sized) assumption
    return int(phys * 0.72)


def _use_fused_path(n_pad, fdims, budget):
    """True iff the whole 3-layer decoder fits in VMEM as one kernel."""
    fi, f1, f2, f3 = fdims
    est = (
        n_pad * n_pad * 2                    # A_hat (bf16), single-buffered (no grid)
        + n_pad * (fi + f1 + f2) * 2         # H + bf16 intermediates
        + n_pad * (f1 + f2) * 4              # f32 intermediates live in-kernel
        + n_pad * f3 * 4                     # f32 output
        + (fi * f1 + f1 * f2 + f2 * f3) * 2  # weights
    )
    return est <= budget // 2                # generous headroom for compiler scratch


# --------------------------------- kernels ----------------------------------
def _fused_decoder_kernel(a_ref, h_ref, w1_ref, b1_ref, w2_ref, b2_ref,
                          w3_ref, b3_ref, o_ref):
    """Whole 3-layer decoder with everything VMEM-resident (small graphs)."""
    a = a_ref[...]  # (n_pad, n_pad) bf16

    def layer(h_bf16, w_ref, b_ref, relu):
        p = jnp.dot(h_bf16, w_ref[...],
                    preferred_element_type=jnp.float32).astype(jnp.bfloat16)
        o = jnp.dot(a, p, preferred_element_type=jnp.float32) + b_ref[...]
        return jnp.maximum(o, 0.0) if relu else o

    h1 = layer(h_ref[...], w1_ref, b1_ref, True).astype(jnp.bfloat16)
    h2 = layer(h1, w2_ref, b2_ref, True).astype(jnp.bfloat16)
    o_ref[...] = layer(h2, w3_ref, b3_ref, False).astype(o_ref.dtype)


def _project_kernel(h_ref, w_ref, p_ref):
    # P_tile = H_tile @ W  (bf16 operands, f32 MXU accumulation)
    p_ref[...] = jnp.dot(
        h_ref[...], w_ref[...], preferred_element_type=jnp.float32
    ).astype(p_ref.dtype)


def _aggregate_kernel(a_ref, p_ref, b_ref, o_ref, acc_ref, *, apply_relu,
                      p_resident, tk):
    # O_tile = act( sum_k A[i, k] @ P[k] + b )
    k = pl.program_id(1)

    @pl.when(k == 0)
    def _():
        acc_ref[...] = jnp.zeros_like(acc_ref)

    if p_resident:
        # P is the whole (n_pad, f_out) matrix, resident in VMEM; slice the
        # k-th reduction chunk out of it (aligned, so the slice is free).
        p_tile = p_ref[pl.ds(pl.multiple_of(k * tk, tk), tk), :]
    else:
        p_tile = p_ref[...]

    acc_ref[...] += jnp.dot(
        a_ref[...], p_tile, preferred_element_type=jnp.float32
    )

    @pl.when(k == pl.num_programs(1) - 1)
    def _():
        out = acc_ref[...] + b_ref[...]
        if apply_relu:
            out = jnp.maximum(out, 0.0)
        o_ref[...] = out.astype(o_ref.dtype)


# --------------------------------- one layer --------------------------------
def _gcn_layer(a_p, h_p, w_p, b_p, *, relu, out_dtype, budget):
    """One GCNConv layer on padded operands: act(A_hat @ (H @ W) + b)."""
    n_pad = a_p.shape[0]
    f_in = h_p.shape[1]
    f_out = w_p.shape[1]
    tm = min(_TM, n_pad)
    tk = min(_TK, n_pad)
    tm_proj = min(_TM_PROJ, n_pad)
    assert n_pad % tm == 0 and n_pad % tk == 0 and n_pad % tm_proj == 0, (
        "n_pad must be a multiple of the tile sizes")

    # ---- stage 1: projection P = H @ W (computed once per layer) ----
    p = pl.pallas_call(
        _project_kernel,
        out_shape=jax.ShapeDtypeStruct((n_pad, f_out), jnp.bfloat16),
        grid_spec=pltpu.PrefetchScalarGridSpec(
            num_scalar_prefetch=0,
            grid=(n_pad // tm_proj,),
            in_specs=[
                pl.BlockSpec((tm_proj, f_in), lambda i: (i, 0)),
                pl.BlockSpec((f_in, f_out), lambda i: (0, 0)),
            ],
            out_specs=pl.BlockSpec((tm_proj, f_out), lambda i: (i, 0)),
        ),
        compiler_params=pltpu.CompilerParams(
            dimension_semantics=("parallel",),
            vmem_limit_bytes=budget,
        ),
    )(h_p, w_p)

    # ---- stage 2: aggregation O = act(A_hat @ P + b), streaming A_hat ----
    out_itemsize = jnp.dtype(out_dtype).itemsize
    # Keep P VMEM-resident (DMA once per layer) when it fits; otherwise
    # stream a (tk, f_out) tile of P per grid step like before.
    resident_bytes = (
        2 * n_pad * f_out * 2          # P (conservatively counted x2)
        + 2 * tm * tk * 2              # A tiles (double buffered)
        + tm * f_out * 4               # f32 accumulator
        + 2 * tm * f_out * out_itemsize
    )
    p_resident = resident_bytes <= budget
    if p_resident:
        p_spec = pl.BlockSpec((n_pad, f_out), lambda i, k: (0, 0))
    else:
        p_spec = pl.BlockSpec((tk, f_out), lambda i, k: (k, 0))

    kernel = functools.partial(
        _aggregate_kernel, apply_relu=relu, p_resident=p_resident, tk=tk)
    cost = pl.CostEstimate(
        flops=2 * n_pad * n_pad * f_out,
        transcendentals=0,
        bytes_accessed=n_pad * n_pad * 2
        + n_pad * f_out * 2 * (1 if p_resident else n_pad // tm)
        + n_pad * f_out * out_itemsize,
    )
    out = pl.pallas_call(
        kernel,
        out_shape=jax.ShapeDtypeStruct((n_pad, f_out), out_dtype),
        grid_spec=pltpu.PrefetchScalarGridSpec(
            num_scalar_prefetch=0,
            grid=(n_pad // tm, n_pad // tk),
            in_specs=[
                pl.BlockSpec((tm, tk), lambda i, k: (i, k)),
                p_spec,
                pl.BlockSpec((1, f_out), lambda i, k: (0, 0)),
            ],
            out_specs=pl.BlockSpec((tm, f_out), lambda i, k: (i, 0)),
            scratch_shapes=[pltpu.VMEM((tm, f_out), jnp.float32)],
        ),
        compiler_params=pltpu.CompilerParams(
            dimension_semantics=("parallel", "arbitrary"),
            vmem_limit_bytes=budget,
        ),
        cost_estimate=cost,
    )(a_p, p, b_p)
    return out


# --------------------------------- wrappers ----------------------------------
def _padded_feature_dims(x, params):
    w1, _, w2, _, w3, _ = params
    return (
        _round_up(x.shape[1], _LANE),
        _round_up(w1.shape[1], _LANE),
        _round_up(w2.shape[1], _LANE),
        _round_up(w3.shape[1], _LANE),
    )


def choose_n_pad(num_nodes, feature_dims, *, force_tiled=False):
    """Pick the padded node count (lane-aligned for fused, tile-aligned else)."""
    fdims = tuple(_round_up(f, _LANE) for f in feature_dims)
    budget = _vmem_budget_bytes()
    if not force_tiled and _use_fused_path(_round_up(num_nodes, _LANE), fdims, budget):
        return _round_up(num_nodes, _LANE)
    return _round_up(num_nodes, _N_ALIGN_TILED)


def prepare_adjacency(a_hat, n_pad):
    """Pad + cast A_hat once per graph (hoisted out of the forward path)."""
    return _pad2(a_hat, n_pad, n_pad).astype(jnp.bfloat16)


def decoder_forward_padded(a_p, x, params, *, force_tiled=False):
    """3-layer GCN decoder on an already padded/bf16 A_hat."""
    w1, b1, w2, b2, w3, b3 = params
    n = x.shape[0]
    n_pad = a_p.shape[0]
    f_out_true = w3.shape[1]
    fi, f1, f2, f3 = _padded_feature_dims(x, params)
    budget = _vmem_budget_bytes()

    h = _pad2(x, n_pad, fi).astype(jnp.bfloat16)
    w1p = _pad2(w1, fi, f1).astype(jnp.bfloat16)
    w2p = _pad2(w2, f1, f2).astype(jnp.bfloat16)
    w3p = _pad2(w3, f2, f3).astype(jnp.bfloat16)
    b1p = _pad2(b1, 1, f1).astype(jnp.float32)
    b2p = _pad2(b2, 1, f2).astype(jnp.float32)
    b3p = _pad2(b3, 1, f3).astype(jnp.float32)

    use_fused = (not force_tiled) and _use_fused_path(n_pad, (fi, f1, f2, f3), budget)
    if use_fused:
        out = pl.pallas_call(
            _fused_decoder_kernel,
            out_shape=jax.ShapeDtypeStruct((n_pad, f3), jnp.float32),
            compiler_params=pltpu.CompilerParams(vmem_limit_bytes=budget),
        )(a_p, h, w1p, b1p, w2p, b2p, w3p, b3p)
    else:
        h1 = _gcn_layer(a_p, h, w1p, b1p, relu=True, out_dtype=jnp.bfloat16,
                        budget=budget)
        h2 = _gcn_layer(a_p, h1, w2p, b2p, relu=True, out_dtype=jnp.bfloat16,
                        budget=budget)
        out = _gcn_layer(a_p, h2, w3p, b3p, relu=False, out_dtype=jnp.float32,
                         budget=budget)

    return out[:n, :f_out_true]


def decoder_forward(a_hat, x, params, *, force_tiled=False):
    """Convenience entry: pads A_hat itself (prefer hoisting prepare_adjacency)."""
    fdims = (x.shape[1], params[0].shape[1], params[2].shape[1], params[4].shape[1])
    n_pad = choose_n_pad(x.shape[0], fdims, force_tiled=force_tiled)
    a_p = prepare_adjacency(a_hat, n_pad)
    return decoder_forward_padded(a_p, x, params, force_tiled=force_tiled)


# ------------------------------ graph plumbing -------------------------------
def build_normalized_adjacency(edge_index, num_nodes):
    """Dense D^{-1/2}(A+I)D^{-1/2} matching torch_geometric gcn_norm."""
    src, dst = edge_index[0], edge_index[1]
    w = jnp.where(src == dst, 0.0, 1.0).astype(jnp.float32)
    adj = jnp.zeros((num_nodes, num_nodes), jnp.float32)
    adj = adj.at[dst, src].add(w)                      # message direction src->dst
    adj = adj + jnp.eye(num_nodes, dtype=jnp.float32)  # one self-loop per node
    deg = adj.sum(axis=1)
    d_inv_sqrt = jnp.where(deg > 0, jax.lax.rsqrt(deg), 0.0)
    return d_inv_sqrt[:, None] * adj * d_inv_sqrt[None, :]


def init_params(key, in_features, hidden_dim, hidden_dim2, out_features):
    """Glorot-uniform weights + zero biases (GCNConv __init__ shapes)."""

    def glorot(k, fan_in, fan_out):
        limit = jnp.sqrt(6.0 / (fan_in + fan_out))
        return jax.random.uniform(k, (fan_in, fan_out), jnp.float32, -limit, limit)

    k1, k2, k3 = jax.random.split(key, 3)
    w1 = glorot(k1, in_features, hidden_dim2)
    b1 = jnp.zeros((1, hidden_dim2), jnp.float32)
    w2 = glorot(k2, hidden_dim2, hidden_dim)
    b2 = jnp.zeros((1, hidden_dim), jnp.float32)
    w3 = glorot(k3, hidden_dim, out_features)
    b3 = jnp.zeros((1, out_features), jnp.float32)
    return (w1, b1, w2, b2, w3, b3)


# ------------------------------- references ----------------------------------
def reference_forward_f32(a_hat, x, params):
    w1, b1, w2, b2, w3, b3 = params
    h = jnp.maximum(a_hat @ (x @ w1) + b1, 0.0)
    h = jnp.maximum(a_hat @ (h @ w2) + b2, 0.0)
    return a_hat @ (h @ w3) + b3


def reference_forward_bf16(a_hat, x, params):
    """Same math as the kernels (bf16 operands, f32 accumulation)."""
    w1, b1, w2, b2, w3, b3 = params
    c = lambda t: t.astype(jnp.bfloat16)

    def gcn(h, w, b, relu):
        p = jnp.dot(c(h), c(w), preferred_element_type=jnp.float32)
        o = jnp.dot(c(a_hat), c(p), preferred_element_type=jnp.float32) + b
        return jnp.maximum(o, 0.0) if relu else o

    h = gcn(x, w1, b1, True)
    h = gcn(h, w2, b2, True)
    return gcn(h, w3, b3, False)


# ----------------------------------- main ------------------------------------
if __name__ == "__main__":
    # Small shapes consistent with the Decoder forward (latent -> reconstruction).
    num_nodes = 192          # exercises N padding
    in_features = 8          # latent dim fed into the decoder
    hidden_dim2 = 16         # deconv1 output
    hidden_dim = 32          # deconv2 output
    out_features = 64        # deconv3 output (reconstructed feature dim)

    key = jax.random.PRNGKey(0)
    k_x, k_e, k_p = jax.random.split(key, 3)

    x = jax.random.normal(k_x, (num_nodes, in_features), jnp.float32)

    num_edges = 512
    edge_index = jax.random.randint(k_e, (2, num_edges), 0, num_nodes)

    a_hat = build_normalized_adjacency(edge_index, num_nodes)
    params = init_params(k_p, in_features, hidden_dim, hidden_dim2, out_features)

    ref = reference_forward_bf16(a_hat, x, params)
    ref32 = reference_forward_f32(a_hat, x, params)

    fdims = (in_features, hidden_dim2, hidden_dim, out_features)
    fwd = jax.jit(decoder_forward_padded, static_argnames=("force_tiled",))

    # ---- fused single-kernel path (small graphs): A_hat padded/cast once ----
    n_pad_fused = choose_n_pad(num_nodes, fdims)
    a_fused = prepare_adjacency(a_hat, n_pad_fused)          # hoisted per-graph
    out = jax.block_until_ready(fwd(a_fused, x, params))
    assert out.shape == (num_nodes, out_features)
    assert jnp.allclose(out, ref, atol=1e-2, rtol=1e-2), float(
        jnp.max(jnp.abs(out - ref)))
    assert jnp.max(jnp.abs(out - ref32)) < 0.25               # bf16 rounding only

    # ---- tiled streaming path (large graphs), exercised via force_tiled ----
    n_pad_tiled = choose_n_pad(num_nodes, fdims, force_tiled=True)
    a_tiled = prepare_adjacency(a_hat, n_pad_tiled)
    out_t = jax.block_until_ready(fwd(a_tiled, x, params, force_tiled=True))
    assert out_t.shape == (num_nodes, out_features)
    assert jnp.allclose(out_t, ref, atol=1e-2, rtol=1e-2), float(
        jnp.max(jnp.abs(out_t - ref)))

    print("KERNEL_OK")
</pallas_src>

<mosaic_0001>
module attributes {stable_mosaic.version = 11 : i64} {
  func.func @_fused_decoder_kernel(%arg0: memref<256x256xbf16, #tpu.memory_space<vmem>>, %arg1: memref<256x128xbf16, #tpu.memory_space<vmem>>, %arg2: memref<128x128xbf16, #tpu.memory_space<vmem>>, %arg3: memref<1x128xf32, #tpu.memory_space<vmem>>, %arg4: memref<128x128xbf16, #tpu.memory_space<vmem>>, %arg5: memref<1x128xf32, #tpu.memory_space<vmem>>, %arg6: memref<128x128xbf16, #tpu.memory_space<vmem>>, %arg7: memref<1x128xf32, #tpu.memory_space<vmem>>, %arg8: memref<256x128xf32, #tpu.memory_space<vmem>>) attributes {dimension_semantics = [], scalar_prefetch = 0 : i64, scratch_operands = 0 : i64, tpu.core_type = #tpu.core_type<tc>} {
    %c0 = arith.constant 0 : index
    %c0_0 = arith.constant 0 : index
    %0 = vector.load %arg0[%c0, %c0_0] : memref<256x256xbf16, #tpu.memory_space<vmem>>, vector<256x256xbf16>
    %c0_1 = arith.constant 0 : index
    %c0_2 = arith.constant 0 : index
    %1 = vector.load %arg1[%c0_1, %c0_2] : memref<256x128xbf16, #tpu.memory_space<vmem>>, vector<256x128xbf16>
    %c0_3 = arith.constant 0 : index
    %c0_4 = arith.constant 0 : index
    %2 = vector.load %arg2[%c0_3, %c0_4] : memref<128x128xbf16, #tpu.memory_space<vmem>>, vector<128x128xbf16>
    %cst = arith.constant dense<0.000000e+00> : vector<256x128xf32>
    %3 = tpu.matmul %1, %2, %cst {dimension_numbers = #tpu.dot_dimension_numbers<[1], [0], [0], [1], [0, 0, 1, 1], [], []>} : vector<256x128xbf16>, vector<128x128xbf16>, vector<256x128xf32> -> vector<256x128xf32>
    %4 = arith.truncf %3 : vector<256x128xf32> to vector<256x128xbf16>
    %cst_5 = arith.constant dense<0.000000e+00> : vector<256x128xf32>
    %5 = tpu.matmul %0, %4, %cst_5 {dimension_numbers = #tpu.dot_dimension_numbers<[1], [0], [0], [1], [0, 0, 1, 1], [], []>} : vector<256x256xbf16>, vector<256x128xbf16>, vector<256x128xf32> -> vector<256x128xf32>
    %c0_6 = arith.constant 0 : index
    %c0_7 = arith.constant 0 : index
    %6 = vector.load %arg3[%c0_6, %c0_7] : memref<1x128xf32, #tpu.memory_space<vmem>>, vector<1x128xf32>
    %7 = vector.broadcast %6 : vector<1x128xf32> to vector<256x128xf32>
    %8 = arith.addf %5, %7 : vector<256x128xf32>
    %cst_8 = arith.constant 0.000000e+00 : f32
    %9 = vector.broadcast %cst_8 : f32 to vector<256x128xf32>
    %10 = arith.maximumf %8, %9 : vector<256x128xf32>
    %11 = arith.truncf %10 : vector<256x128xf32> to vector<256x128xbf16>
    %c0_9 = arith.constant 0 : index
    %c0_10 = arith.constant 0 : index
    %12 = vector.load %arg4[%c0_9, %c0_10] : memref<128x128xbf16, #tpu.memory_space<vmem>>, vector<128x128xbf16>
    %cst_11 = arith.constant dense<0.000000e+00> : vector<256x128xf32>
    %13 = tpu.matmul %11, %12, %cst_11 {dimension_numbers = #tpu.dot_dimension_numbers<[1], [0], [0], [1], [0, 0, 1, 1], [], []>} : vector<256x128xbf16>, vector<128x128xbf16>, vector<256x128xf32> -> vector<256x128xf32>
    %14 = arith.truncf %13 : vector<256x128xf32> to vector<256x128xbf16>
    %cst_12 = arith.constant dense<0.000000e+00> : vector<256x128xf32>
    %15 = tpu.matmul %0, %14, %cst_12 {dimension_numbers = #tpu.dot_dimension_numbers<[1], [0], [0], [1], [0, 0, 1, 1], [], []>} : vector<256x256xbf16>, vector<256x128xbf16>, vector<256x128xf32> -> vector<256x128xf32>
    %c0_13 = arith.constant 0 : index
    %c0_14 = arith.constant 0 : index
    %16 = vector.load %arg5[%c0_13, %c0_14] : memref<1x128xf32, #tpu.memory_space<vmem>>, vector<1x128xf32>
    %17 = vector.broadcast %16 : vector<1x128xf32> to vector<256x128xf32>
    %18 = arith.addf %15, %17 : vector<256x128xf32>
    %cst_15 = arith.constant 0.000000e+00 : f32
    %19 = vector.broadcast %cst_15 : f32 to vector<256x128xf32>
    %20 = arith.maximumf %18, %19 : vector<256x128xf32>
    %21 = arith.truncf %20 : vector<256x128xf32> to vector<256x128xbf16>
    %c0_16 = arith.constant 0 : index
    %c0_17 = arith.constant 0 : index
    %22 = vector.load %arg6[%c0_16, %c0_17] : memref<128x128xbf16, #tpu.memory_space<vmem>>, vector<128x128xbf16>
    %cst_18 = arith.constant dense<0.000000e+00> : vector<256x128xf32>
    %23 = tpu.matmul %21, %22, %cst_18 {dimension_numbers = #tpu.dot_dimension_numbers<[1], [0], [0], [1], [0, 0, 1, 1], [], []>} : vector<256x128xbf16>, vector<128x128xbf16>, vector<256x128xf32> -> vector<256x128xf32>
    %24 = arith.truncf %23 : vector<256x128xf32> to vector<256x128xbf16>
    %cst_19 = arith.constant dense<0.000000e+00> : vector<256x128xf32>
    %25 = tpu.matmul %0, %24, %cst_19 {dimension_numbers = #tpu.dot_dimension_numbers<[1], [0], [0], [1], [0, 0, 1, 1], [], []>} : vector<256x256xbf16>, vector<256x128xbf16>, vector<256x128xf32> -> vector<256x128xf32>
    %c0_20 = arith.constant 0 : index
    %c0_21 = arith.constant 0 : index
    %26 = vector.load %arg7[%c0_20, %c0_21] : memref<1x128xf32, #tpu.memory_space<vmem>>, vector<1x128xf32>
    %27 = vector.broadcast %26 : vector<1x128xf32> to vector<256x128xf32>
    %28 = arith.addf %25, %27 : vector<256x128xf32>
    %c0_22 = arith.constant 0 : index
    %c0_23 = arith.constant 0 : index
    %29 = vector.load %arg8[%c0_22, %c0_23] : memref<256x128xf32, #tpu.memory_space<vmem>>, vector<256x128xf32>
    tpu.vector_store %arg8[%c0_22, %c0_23], %28 {strides = array<i32>} : memref<256x128xf32, #tpu.memory_space<vmem>>, vector<256x128xf32>,
    return
  }
}

</mosaic_0001>

<bundles_post_ra>
// kernel: decoder_forward_padded.1
= control target key start
LH: loop header
LB: loop body
LE: loop exit
PB: predicated region body
PF: predicated region fallthrough
CT: control target
= control target key end

     0   :  { %s3167_s2 = inlined_call_operand.vmem [shape: bf16[128,128], index: 2, kind: input, shape index: {}]   ;;  %s3168_s1 = inlined_call_operand.vmem [shape: bf16[256,128], index: 1, kind: input, shape index: {}]   ;;  %s3169_s0 = inlined_call_operand.vmem [shape: bf16[256,256], index: 0, kind: input, shape index: {}]   ;;  %s3170_s4 = inlined_call_operand.vmem [shape: bf16[128,128], index: 4, kind: input, shape index: {}]   ;;  %s3171_s3 = inlined_call_operand.vmem [shape: f32[1,128], index: 3, kind: input, shape index: {}]   ;;  %s3172_s6 = inlined_call_operand.vmem [shape: bf16[128,128], index: 6, kind: input, shape index: {}]   ;;  %s3173_s5 = inlined_call_operand.vmem [shape: f32[1,128], index: 5, kind: input, shape index: {}]   ;;  %s3174_s7 = inlined_call_operand.vmem [shape: f32[1,128], index: 7, kind: input, shape index: {}]   ;;  %s3175_s8 = inlined_call_operand.vmem [shape: f32[256,128], index: 8, kind: output, shape index: {}]  }
   0x1   :  { %v2352_v0 = vld [vmem:[%s3167_s2] sm:$0xff]   ;;  %v2353_v1 = vld [vmem:[%s3167_s2 + $0x8] sm:$0xff]   ;;  %v2354_v2 = vld [vmem:[%s3167_s2 + $0x10] sm:$0xff]  }
   0x2   :  { %2192 = vmatprep.subr.bf16.mxu0 %v2352_v0  ;;  %v2355_v3 = vld [vmem:[%s3167_s2 + $0x18] sm:$0xff]   ;;  %v2360_v4 = vld [vmem:[%s3168_s1] sm:$0xff]   ;;  %v2357_v6 = vld [vmem:[%s3167_s2 + $0x28] sm:$0xff]  }
   0x3   :  { %2193 = vmatpush3.bf16.msra.mxu0 %v2352_v0  ;;  %2208 = vmatprep.mubr.bf16.mxu0 %v2360_v4  ;;  %v2356_v5 = vld [vmem:[%s3167_s2 + $0x20] sm:$0xff]   ;;  %v2358_v7 = vld [vmem:[%s3167_s2 + $0x30] sm:$0xff]   ;;  %v2359_v8 = vld [vmem:[%s3167_s2 + $0x38] sm:$0xff]  }
   0x4   :  { %2194 = vmatprep.subr.bf16.mxu0 %v2353_v1  ;;  %v2361_v9 = vld [vmem:[%s3168_s1 + $0x8] sm:$0xff]   ;;  %v2362_v10 = vld [vmem:[%s3168_s1 + $0x10] sm:$0xff]   ;;  %v2363_v11 = vld [vmem:[%s3168_s1 + $0x18] sm:$0xff]  }
   0x5   :  { %v2364_v12 = vld [vmem:[%s3168_s1 + $0x20] sm:$0xff]   ;;  %v2365_v13 = vld [vmem:[%s3168_s1 + $0x28] sm:$0xff]   ;;  %v2366_v14 = vld [vmem:[%s3168_s1 + $0x30] sm:$0xff]  }
   0x6   :  { %v2367_v15 = vld [vmem:[%s3168_s1 + $0x38] sm:$0xff]   ;;  %v2368_v16 = vld [vmem:[%s3168_s1 + $0x40] sm:$0xff]   ;;  %v2369_v17 = vld [vmem:[%s3168_s1 + $0x48] sm:$0xff]  }
   0x7   :  { %2195 = vmatpush3.bf16.msra.mxu0 %v2353_v1  ;;  %v2370_v18 = vld [vmem:[%s3168_s1 + $0x50] sm:$0xff]   ;;  %v2371_v19 = vld [vmem:[%s3168_s1 + $0x58] sm:$0xff]   ;;  %v2372_v20 = vld [vmem:[%s3168_s1 + $0x60] sm:$0xff]  }
   0x8   :  { %2196 = vmatprep.subr.bf16.mxu0 %v2354_v2  ;;  %v2373_v21 = vld [vmem:[%s3168_s1 + $0x68] sm:$0xff]   ;;  %v2374_v22 = vld [vmem:[%s3168_s1 + $0x70] sm:$0xff]   ;;  %v2375_v23 = vld [vmem:[%s3168_s1 + $0x78] sm:$0xff]  }
   0x9   :  { %v2592_v24 = vld [vmem:[%s3169_s0 + $0x4] ss:$8 sps:$4 sm:$0xff]  }
   0xa   :  { %v2597_v25 = vld [vmem:[%s3169_s0 + $0x44] ss:$8 sps:$4 sm:$0xff]  }
   0xb   :  { %2197 = vmatpush3.bf16.msra.mxu0 %v2354_v2  ;;  %662 = vmatprep.mubr.bf16.mxu1 %v2597_v25 }
   0xc   :  { %2198 = vmatprep.subr.bf16.mxu0 %v2355_v3 }
   0xf   :  { %2199 = vmatpush3.bf16.msra.mxu0 %v2355_v3 }
  0x10   :  { %2200 = vmatprep.subr.bf16.mxu0 %v2356_v5 }
  0x13   :  { %2201 = vmatpush3.bf16.msra.mxu0 %v2356_v5 }
  0x14   :  { %2202 = vmatprep.subr.bf16.mxu0 %v2357_v6 }
  0x17   :  { %2203 = vmatpush3.bf16.msra.mxu0 %v2357_v6 }
  0x18   :  { %2204 = vmatprep.subr.bf16.mxu0 %v2358_v7 }
  0x1b   :  { %2205 = vmatpush3.bf16.msra.mxu0 %v2358_v7 }
  0x1c   :  { %2206 = vmatprep.subr.bf16.mxu0 %v2359_v8 }
  0x1f   :  { %2207 = vmatpush3.bf16.msra.mxu0 %v2359_v8 }
  0x22   :  { %2209 = vmatmul.mubr.bf16.vlgmr.msra.gmra.mrb[0].mxu0 %v2361_v9 }
  0x23   :  { %2212 = vmatprep.mubr.bf16.mxu0 %v2362_v10  ;;  %v2424_v10 = vld [vmem:[%s3170_s4] sm:$0xff]  }
  0x2a   :  { %2213 = vmatmul.mubr.bf16.gmra.mrb[4].mxu0 %v2363_v11  ;;  %v2607_v11 = vld [vmem:[%s3169_s0] ss:$8 sps:$4 sm:$0xff]  }
  0x2b   :  { %2216 = vmatprep.mubr.bf16.mxu0 %v2364_v12  ;;  %v2612_v12 = vld [vmem:[%s3169_s0 + $0x40] ss:$8 sps:$4 sm:$0xff]  }
  0x32   :  { %2217 = vmatmul.mubr.bf16.gmra.mrb[8].mxu0 %v2365_v13  ;;  %v2617_v13 = vld [vmem:[%s3169_s0 + $0x14] ss:$8 sps:$4 sm:$0xff]  }
  0x33   :  { %2220 = vmatprep.mubr.bf16.mxu0 %v2366_v14  ;;  %v2622_v14 = vld [vmem:[%s3169_s0 + $0x54] ss:$8 sps:$4 sm:$0xff]  }
  0x3a   :  { %2221 = vmatmul.mubr.bf16.gmra.mrb[12].mxu0 %v2367_v15  ;;  %v2425_v15 = vld [vmem:[%s3170_s4 + $0x8] sm:$0xff]  }
  0x3b   :  { %2224 = vmatprep.mubr.bf16.mxu0 %v2368_v16  ;;  %v2426_v16 = vld [vmem:[%s3170_s4 + $0x10] sm:$0xff]  }
  0x42   :  { %2225 = vmatmul.mubr.bf16.gmra.mrb[16].mxu0 %v2369_v17  ;;  %v2637_v17 = vld [vmem:[%s3169_s0 + $0x10] ss:$8 sps:$4 sm:$0xff]  }
  0x43   :  { %2228 = vmatprep.mubr.bf16.mxu0 %v2370_v18  ;;  %v2642_v18 = vld [vmem:[%s3169_s0 + $0x50] ss:$8 sps:$4 sm:$0xff]  }
  0x4a   :  { %2229 = vmatmul.mubr.bf16.gmra.mrb[20].mxu0 %v2371_v19  ;;  %v2647_v19 = vld [vmem:[%s3169_s0 + $0x24] ss:$8 sps:$4 sm:$0xff]  }
  0x4b   :  { %2232 = vmatprep.mubr.bf16.mxu0 %v2372_v20  ;;  %v2652_v20 = vld [vmem:[%s3169_s0 + $0x64] ss:$8 sps:$4 sm:$0xff]  }
  0x52   :  { %2233 = vmatmul.mubr.bf16.gmra.mrb[24].mxu0 %v2373_v21  ;;  %v2661_v21 = vld [vmem:[%s3169_s0 + $0x20] ss:$8 sps:$4 sm:$0xff]  }
  0x53   :  { %2236 = vmatprep.mubr.bf16.mxu0 %v2374_v22  ;;  %v2666_v22 = vld [vmem:[%s3169_s0 + $0x60] ss:$8 sps:$4 sm:$0xff]  }
  0x5a   :  { %2237 = vmatmul.mubr.bf16.gmra.mrb[28].mxu0 %v2375_v23  ;;  %v2671_v23 = vld [vmem:[%s3169_s0 + $0x34] ss:$8 sps:$4 sm:$0xff]  }
  0x5b   :  { %630 = vmatprep.mubr.bf16.mxu0 %v2592_v24 }
  0xf5   :  { %v2210_v26 = vpop.f32.mrb[0].mxu0 }
  0xf6   :  { %v288_v27 = vpop.f32.mrb[1].mxu0 }
  0xf7   :  { %v2211_v28 = vpop.f32.mrb[2].mxu0 }
  0xf8   :  { %v416_v29 = vpack.c.bf16 %v2211_v28, %v2210_v26  ;;  %v291_v30 = vpop.f32.mrb[3].mxu0  ;;  %v2676_v26 = vld [vmem:[%s3169_s0 + $0x74] ss:$8 sps:$4 sm:$0xff]   ;;  %v2690_v28 = vld [vmem:[%s3169_s0 + $0x70] ss:$8 sps:$4 sm:$0xff]  }
  0xf9   :  { %v415_v31 = vpack.c.bf16 %v291_v30, %v288_v27  ;;  %v2685_v27 = vld [vmem:[%s3169_s0 + $0x30] ss:$8 sps:$4 sm:$0xff]   ;;  %v2703_v30 = vld [vmem:[%s3169_s0 + $0x80] ss:$8 sps:$4 sm:$0xff]  }
  0xfd   :  { %v2214_v32 = vpop.f32.mrb[4].mxu0 }
  0xfe   :  { %v304_v33 = vpop.f32.mrb[5].mxu0 }
  0xff   :  { %v2215_v34 = vpop.f32.mrb[6].mxu0 }
 0x100   :  { %v418_v35 = vpack.c.bf16 %v2215_v34, %v2214_v32  ;;  %v307_v36 = vpop.f32.mrb[7].mxu0  ;;  %v2715_v32 = vld [vmem:[%s3169_s0 + $0x90] ss:$8 sps:$4 sm:$0xff]   ;;  %v2727_v34 = vld [vmem:[%s3169_s0 + $0xa0] ss:$8 sps:$4 sm:$0xff]  }
 0x101   :  { %v417_v37 = vpack.c.bf16 %v307_v36, %v304_v33  ;;  %v2720_v33 = vld [vmem:[%s3169_s0 + $0xa4] ss:$8 sps:$4 sm:$0xff]   ;;  %v2739_v36 = vld [vmem:[%s3169_s0 + $0xb0] ss:$8 sps:$4 sm:$0xff]  }
 0x105   :  { %v2218_v38 = vpop.f32.mrb[8].mxu0 }
 0x106   :  { %v320_v39 = vpop.f32.mrb[9].mxu0 }
 0x107   :  { %v2219_v40 = vpop.f32.mrb[10].mxu0 }
 0x108   :  { %v420_v41 = vpack.c.bf16 %v2219_v40, %v2218_v38  ;;  %v323_v42 = vpop.f32.mrb[11].mxu0  ;;  %v2751_v38 = vld [vmem:[%s3169_s0 + $0xc0] ss:$8 sps:$4 sm:$0xff]   ;;  %v2763_v40 = vld [vmem:[%s3169_s0 + $0xd0] ss:$8 sps:$4 sm:$0xff]  }
 0x109   :  { %v419_v43 = vpack.c.bf16 %v323_v42, %v320_v39  ;;  %v2756_v39 = vld [vmem:[%s3169_s0 + $0xd4] ss:$8 sps:$4 sm:$0xff]   ;;  %v2775_v42 = vld [vmem:[%s3169_s0 + $0xe0] ss:$8 sps:$4 sm:$0xff]  }
 0x10d   :  { %v2222_v44 = vpop.f32.mrb[12].mxu0 }
 0x10e   :  { %v336_v45 = vpop.f32.mrb[13].mxu0 }
 0x10f   :  { %v2223_v46 = vpop.f32.mrb[14].mxu0 }
 0x110   :  { %v422_v47 = vpack.c.bf16 %v2223_v46, %v2222_v44  ;;  %v339_v48 = vpop.f32.mrb[15].mxu0  ;;  %v2427_v44 = vld [vmem:[%s3170_s4 + $0x18] sm:$0xff]   ;;  %v2428_v46 = vld [vmem:[%s3170_s4 + $0x20] sm:$0xff]  }
 0x111   :  { %v421_v49 = vpack.c.bf16 %v339_v48, %v336_v45  ;;  %v2790_v45 = vld [vmem:[%s3169_s0 + $0xf0] ss:$8 sps:$4 sm:$0xff]  }
 0x112   :  { %v2430_v48 = vld [vmem:[%s3170_s4 + $0x30] sm:$0xff]  }
 0x115   :  { %v2226_v50 = vpop.f32.mrb[16].mxu0 }
 0x116   :  { %v352_v51 = vpop.f32.mrb[17].mxu0 }
 0x117   :  { %v2227_v52 = vpop.f32.mrb[18].mxu0 }
 0x118   :  { %v424_v53 = vpack.c.bf16 %v2227_v52, %v2226_v50  ;;  %v355_v54 = vpop.f32.mrb[19].mxu0  ;;  %v2808_v52 = vld [vmem:[%s3171_s3] ss:$0 sm:$0xff] }
 0x119   :  { %v423_v55 = vpack.c.bf16 %v355_v54, %v352_v51 }
 0x11b   :  { %1808 = vmatprep.subr.bf16.mxu0 %v423_v55  ;;  %2336 = vmatprep.subr.bf16.mxu1 %v423_v55 }
 0x11c   :  { %1809 = vmatpush3.bf16.msra.mxu0 %v415_v31  ;;  %2344 = vmatpush3.bf16.msra.mxu1 %v415_v31  ;;  %v2708_v31 = vld [vmem:[%s3169_s0 + $0x94] ss:$8 sps:$4 sm:$0xff]  }
 0x11d   :  { %v2230_v56 = vpop.f32.mrb[20].mxu0  ;;  %1810 = vmatprep.subr.bf16.mxu0 %v424_v53  ;;  %2337 = vmatprep.subr.bf16.mxu1 %v424_v53 }
 0x11e   :  { %v368_v57 = vpop.f32.mrb[21].mxu0 }
 0x11f   :  { %v2231_v58 = vpop.f32.mrb[22].mxu0 }
 0x120   :  { %v426_v59 = vpack.c.bf16 %v2231_v58, %v2230_v56  ;;  %v371_v60 = vpop.f32.mrb[23].mxu0  ;;  %1811 = vmatpush3.bf16.msra.mxu0 %v416_v29  ;;  %2345 = vmatpush3.bf16.msra.mxu1 %v416_v29  ;;  %v2695_v29 = vld [vmem:[%s3169_s0 + $0x84] ss:$8 sps:$4 sm:$0xff]  }
 0x121   :  { %v425_v61 = vpack.c.bf16 %v371_v60, %v368_v57 }
 0x123   :  { %1812 = vmatprep.subr.bf16.mxu0 %v425_v61  ;;  %2338 = vmatprep.subr.bf16.mxu1 %v425_v61 }
 0x124   :  { %1813 = vmatpush3.bf16.msra.mxu0 %v417_v37  ;;  %2346 = vmatpush3.bf16.msra.mxu1 %v417_v37  ;;  %v2744_v37 = vld [vmem:[%s3169_s0 + $0xc4] ss:$8 sps:$4 sm:$0xff]  }
 0x125   :  { %v2234_v62 = vpop.f32.mrb[24].mxu0  ;;  %1814 = vmatprep.subr.bf16.mxu0 %v426_v59  ;;  %2339 = vmatprep.subr.bf16.mxu1 %v426_v59 }
 0x126   :  { %v384_v63 = vpop.f32.mrb[25].mxu0 }
 0x127   :  { %v2235_v0 = vpop.f32.mrb[26].mxu0 }
 0x128   :  { %v428_v1 = vpack.c.bf16 %v2235_v0, %v2234_v62  ;;  %v387_v2 = vpop.f32.mrb[27].mxu0  ;;  %1815 = vmatpush3.bf16.msra.mxu0 %v418_v35  ;;  %2347 = vmatpush3.bf16.msra.mxu1 %v418_v35  ;;  %v2732_v35 = vld [vmem:[%s3169_s0 + $0xb4] ss:$8 sps:$4 sm:$0xff]  }
 0x129   :  { %v427_v3 = vpack.c.bf16 %v387_v2, %v384_v63 }
 0x12b   :  { %1816 = vmatprep.subr.bf16.mxu0 %v427_v3  ;;  %2340 = vmatprep.subr.bf16.mxu1 %v427_v3 }
 0x12c   :  { %1817 = vmatpush3.bf16.msra.mxu0 %v419_v43  ;;  %2348 = vmatpush3.bf16.msra.mxu1 %v419_v43  ;;  %v2780_v43 = vld [vmem:[%s3169_s0 + $0xf4] ss:$8 sps:$4 sm:$0xff]  }
 0x12d   :  { %v2238_v4 = vpop.f32.mrb[28].mxu0  ;;  %1818 = vmatprep.subr.bf16.mxu0 %v428_v1  ;;  %2341 = vmatprep.subr.bf16.mxu1 %v428_v1 }
 0x12e   :  { %v400_v5 = vpop.f32.mrb[29].mxu0 }
 0x12f   :  { %v2239_v6 = vpop.f32.mrb[30].mxu0 }
 0x130   :  { %v430_v7 = vpack.c.bf16 %v2239_v6, %v2238_v4  ;;  %v403_v8 = vpop.f32.mrb[31].mxu0  ;;  %1819 = vmatpush3.bf16.msra.mxu0 %v420_v41  ;;  %2349 = vmatpush3.bf16.msra.mxu1 %v420_v41  ;;  %v2768_v41 = vld [vmem:[%s3169_s0 + $0xe4] ss:$8 sps:$4 sm:$0xff]  }
 0x131   :  { %v429_v9 = vpack.c.bf16 %v403_v8, %v400_v5 }
 0x133   :  { %1820 = vmatprep.subr.bf16.mxu0 %v429_v9  ;;  %2342 = vmatprep.subr.bf16.mxu1 %v429_v9 }
 0x134   :  { %1821 = vmatpush3.bf16.msra.mxu0 %v421_v49  ;;  %2350 = vmatpush3.bf16.msra.mxu1 %v421_v49  ;;  %v2431_v49 = vld [vmem:[%s3170_s4 + $0x38] sm:$0xff]  }
 0x135   :  { %1822 = vmatprep.subr.bf16.mxu0 %v430_v7  ;;  %2343 = vmatprep.subr.bf16.mxu1 %v430_v7 }
 0x138   :  { %1823 = vmatpush3.bf16.msra.mxu0 %v422_v47  ;;  %2351 = vmatpush3.bf16.msra.mxu1 %v422_v47  ;;  %v2429_v47 = vld [vmem:[%s3170_s4 + $0x28] sm:$0xff]  }
 0x139   :  { %2240 = vmatprep.subr.bf16.mxu0 %v2424_v10 }
 0x13b   :  { %631 = vmatmul.mubr.bf16.vlgmr.msra.gmra.mrb[32].mxu0 %v2607_v11  ;;  %663 = vmatmul.mubr.bf16.vlgmr.msra.gmra.mrb[0].mxu1 %v2612_v12 }
 0x13c   :  { %638 = vmatprep.mubr.bf16.mxu0 %v2617_v13  ;;  %670 = vmatprep.mubr.bf16.mxu1 %v2622_v14 }
 0x13d   :  { %2241 = vmatpush3.bf16.msra.mxu0 %v2424_v10 }
 0x13e   :  { %2242 = vmatprep.subr.bf16.mxu0 %v2425_v15 }
 0x141   :  { %2243 = vmatpush3.bf16.msra.mxu0 %v2425_v15 }
 0x142   :  { %2244 = vmatprep.subr.bf16.mxu0 %v2426_v16 }
 0x143   :  { %639 = vmatmul.mubr.bf16.gmra.mrb[36].mxu0 %v2637_v17  ;;  %671 = vmatmul.mubr.bf16.gmra.mrb[4].mxu1 %v2642_v18 }
 0x144   :  { %646 = vmatprep.mubr.bf16.mxu0 %v2647_v19  ;;  %678 = vmatprep.mubr.bf16.mxu1 %v2652_v20 }
 0x145   :  { %2245 = vmatpush3.bf16.msra.mxu0 %v2426_v16 }
 0x146   :  { %2246 = vmatprep.subr.bf16.mxu0 %v2427_v44 }
 0x149   :  { %2247 = vmatpush3.bf16.msra.mxu0 %v2427_v44 }
 0x14a   :  { %2248 = vmatprep.subr.bf16.mxu0 %v2428_v46 }
 0x14b   :  { %647 = vmatmul.mubr.bf16.gmra.mrb[40].mxu0 %v2661_v21  ;;  %679 = vmatmul.mubr.bf16.gmra.mrb[8].mxu1 %v2666_v22 }
 0x14c   :  { %654 = vmatprep.mubr.bf16.mxu0 %v2671_v23  ;;  %686 = vmatprep.mubr.bf16.mxu1 %v2676_v26 }
 0x14d   :  { %2249 = vmatpush3.bf16.msra.mxu0 %v2428_v46 }
 0x14e   :  { %2250 = vmatprep.subr.bf16.mxu0 %v2429_v47 }
 0x151   :  { %2251 = vmatpush3.bf16.msra.mxu0 %v2429_v47 }
 0x152   :  { %2252 = vmatprep.subr.bf16.mxu0 %v2430_v48 }
 0x153   :  { %655 = vmatmul.mubr.bf16.gmra.mrb[44].mxu0 %v2685_v27  ;;  %687 = vmatmul.mubr.bf16.gmra.mrb[12].mxu1 %v2690_v28 }
 0x154   :  { %694 = vmatprep.mubr.bf16.mxu1 %v2695_v29 }
 0x155   :  { %2253 = vmatpush3.bf16.msra.mxu0 %v2430_v48 }
 0x156   :  { %2254 = vmatprep.subr.bf16.mxu0 %v2431_v49 }
 0x159   :  { %2255 = vmatpush3.bf16.msra.mxu0 %v2431_v49 }
 0x15b   :  { %695 = vmatmul.mubr.bf16.gmra.mrb[16].mxu1 %v2703_v30 }
 0x15c   :  { %702 = vmatprep.mubr.bf16.mxu1 %v2708_v31 }
 0x163   :  { %703 = vmatmul.mubr.bf16.gmra.mrb[20].mxu1 %v2715_v32 }
 0x164   :  { %710 = vmatprep.mubr.bf16.mxu1 %v2720_v33 }
 0x16b   :  { %711 = vmatmul.mubr.bf16.gmra.mrb[24].mxu1 %v2727_v34 }
 0x16c   :  { %718 = vmatprep.mubr.bf16.mxu1 %v2732_v35 }
 0x173   :  { %719 = vmatmul.mubr.bf16.gmra.mrb[28].mxu1 %v2739_v36 }
 0x174   :  { %726 = vmatprep.mubr.bf16.mxu1 %v2744_v37 }
 0x17b   :  { %727 = vmatmul.mubr.bf16.gmra.mrb[32].mxu1 %v2751_v38 }
 0x17c   :  { %734 = vmatprep.mubr.bf16.mxu1 %v2756_v39 }
 0x183   :  { %735 = vmatmul.mubr.bf16.gmra.mrb[36].mxu1 %v2763_v40 }
 0x184   :  { %742 = vmatprep.mubr.bf16.mxu1 %v2768_v41 }
 0x18b   :  { %743 = vmatmul.mubr.bf16.gmra.mrb[40].mxu1 %v2775_v42 }
 0x18c   :  { %750 = vmatprep.mubr.bf16.mxu1 %v2780_v43 }
 0x193   :  { %751 = vmatmul.mubr.bf16.gmra.mrb[44].mxu1 %v2790_v45 }
 0x20e   :  { %v1824_v50 = vpop.f32.mrb[32].mxu0  ;;  %v1848_v51 = vpop.f32.mrb[0].mxu1 }
 0x20f   :  { %v1825_v53 = vpop.f32.mrb[33].mxu0  ;;  %v1849_v54 = vpop.f32.mrb[1].mxu1 }
 0x210   :  { %v1826_v55 = vadd.f32 %v1825_v53, %v1824_v50  ;;  %v1827_v56 = vpop.f32.mrb[34].mxu0  ;;  %v1850_v57 = vadd.f32 %v1849_v54, %v1848_v51  ;;  %v1851_v58 = vpop.f32.mrb[2].mxu1 }
 0x211   :  { %v1828_v59 = vpop.f32.mrb[35].mxu0  ;;  %v1852_v60 = vpop.f32.mrb[3].mxu1 }
 0x212   :  { %v633_v61 = vadd.f32 %v1826_v55, %v2808_v52  ;;  %v1829_v62 = vadd.f32 %v1828_v59, %v1827_v56  ;;  %v665_v63 = vadd.f32 %v1850_v57, %v2808_v52  ;;  %v1853_v0 = vadd.f32 %v1852_v60, %v1851_v58 }
 0x214   :  { %v759_v1 = vmax.f32 %v633_v61, 0.0  ;;  %v636_v2 = vadd.f32 %v1829_v62, %v2808_v52  ;;  %v668_v3 = vadd.f32 %v1853_v0, %v2808_v52  ;;  %v767_v5 = vmax.f32 %v665_v63, 0.0 }
 0x216   :  { %v760_v4 = vmax.f32 %v636_v2, 0.0  ;;  %v1830_v6 = vpop.f32.mrb[36].mxu0  ;;  %v768_v7 = vmax.f32 %v668_v3, 0.0  ;;  %v1854_v8 = vpop.f32.mrb[4].mxu1 }
 0x217   :  { %v1831_v9 = vpop.f32.mrb[37].mxu0  ;;  %v1855_v10 = vpop.f32.mrb[5].mxu1 }
 0x218   :  { %v1832_v15 = vadd.f32 %v1831_v9, %v1830_v6  ;;  %v1833_v16 = vpop.f32.mrb[38].mxu0  ;;  %v791_v44 = vpack.c.bf16 %v760_v4, %v759_v1  ;;  %v1856_v46 = vadd.f32 %v1855_v10, %v1854_v8  ;;  %v1857_v47 = vpop.f32.mrb[6].mxu1  ;;  %v2814_v48 = vpack.c.bf16 %v768_v7, %v767_v5 }
 0x219   :  { %v1834_v49 = vpop.f32.mrb[39].mxu0  ;;  %v1858_v50 = vpop.f32.mrb[7].mxu1 }
 0x21a   :  { %v641_v51 = vadd.f32 %v1832_v15, %v2808_v52  ;;  %v1835_v53 = vadd.f32 %v1834_v49, %v1833_v16  ;;  %2256 = vmatprep.mubr.bf16.mxu0 %v791_v44  ;;  %v673_v54 = vadd.f32 %v1856_v46, %v2808_v52  ;;  %v1859_v55 = vadd.f32 %v1858_v50, %v1857_v47 }
 0x21c   :  { %v761_v56 = vmax.f32 %v641_v51, 0.0  ;;  %v644_v57 = vadd.f32 %v1835_v53, %v2808_v52  ;;  %v676_v58 = vadd.f32 %v1859_v55, %v2808_v52  ;;  %v769_v60 = vmax.f32 %v673_v54, 0.0 }
 0x21e   :  { %v762_v59 = vmax.f32 %v644_v57, 0.0  ;;  %v1836_v61 = vpop.f32.mrb[40].mxu0  ;;  %v770_v62 = vmax.f32 %v676_v58, 0.0  ;;  %v1860_v63 = vpop.f32.mrb[8].mxu1 }
 0x21f   :  { %v1837_v0 = vpop.f32.mrb[41].mxu0  ;;  %v1861_v1 = vpop.f32.mrb[9].mxu1 }
 0x220   :  { %v792_v2 = vpack.c.bf16 %v762_v59, %v761_v56  ;;  %v1838_v3 = vadd.f32 %v1837_v0, %v1836_v61  ;;  %v1839_v4 = vpop.f32.mrb[42].mxu0  ;;  %v1862_v5 = vadd.f32 %v1861_v1, %v1860_v63  ;;  %v1863_v6 = vpop.f32.mrb[10].mxu1  ;;  %v796_v7 = vpack.c.bf16 %v770_v62, %v769_v60 }
 0x221   :  { %v1840_v8 = vpop.f32.mrb[43].mxu0  ;;  %v1864_v9 = vpop.f32.mrb[11].mxu1 }
 0x222   :  { %v649_v10 = vadd.f32 %v1838_v3, %v2808_v52  ;;  %v1841_v15 = vadd.f32 %v1840_v8, %v1839_v4  ;;  %2257 = vmatmul.mubr.bf16.vlgmr.msra.gmra.mrb[48].mxu0 %v792_v2  ;;  %v681_v16 = vadd.f32 %v1862_v5, %v2808_v52  ;;  %v1865_v44 = vadd.f32 %v1864_v9, %v1863_v6 }
 0x224   :  { %v763_v46 = vmax.f32 %v649_v10, 0.0  ;;  %v652_v47 = vadd.f32 %v1841_v15, %v2808_v52  ;;  %v684_v49 = vadd.f32 %v1865_v44, %v2808_v52  ;;  %v771_v51 = vmax.f32 %v681_v16, 0.0 }
 0x226   :  { %v764_v50 = vmax.f32 %v652_v47, 0.0  ;;  %v1842_v53 = vpop.f32.mrb[44].mxu0  ;;  %v772_v54 = vmax.f32 %v684_v49, 0.0  ;;  %v1866_v55 = vpop.f32.mrb[12].mxu1 }
 0x227   :  { %v1843_v56 = vpop.f32.mrb[45].mxu0  ;;  %v1867_v57 = vpop.f32.mrb[13].mxu1 }
 0x228   :  { %v1844_v58 = vadd.f32 %v1843_v56, %v1842_v53  ;;  %v1845_v59 = vpop.f32.mrb[46].mxu0  ;;  %v793_v60 = vpack.c.bf16 %v764_v50, %v763_v46  ;;  %v1868_v61 = vadd.f32 %v1867_v57, %v1866_v55  ;;  %v1869_v62 = vpop.f32.mrb[14].mxu1  ;;  %v797_v63 = vpack.c.bf16 %v772_v54, %v771_v51 }
 0x229   :  { %v1846_v0 = vpop.f32.mrb[47].mxu0  ;;  %v1870_v1 = vpop.f32.mrb[15].mxu1 }
 0x22a   :  { %v657_v2 = vadd.f32 %v1844_v58, %v2808_v52  ;;  %v1847_v3 = vadd.f32 %v1846_v0, %v1845_v59  ;;  %2260 = vmatprep.mubr.bf16.mxu0 %v793_v60  ;;  %v689_v4 = vadd.f32 %v1868_v61, %v2808_v52  ;;  %v1871_v5 = vadd.f32 %v1870_v1, %v1869_v62 }
 0x22c   :  { %v765_v6 = vmax.f32 %v657_v2, 0.0  ;;  %v660_v8 = vadd.f32 %v1847_v3, %v2808_v52  ;;  %v692_v9 = vadd.f32 %v1871_v5, %v2808_v52  ;;  %v773_v15 = vmax.f32 %v689_v4, 0.0 }
 0x22e   :  { %v766_v10 = vmax.f32 %v660_v8, 0.0  ;;  %v774_v16 = vmax.f32 %v692_v9, 0.0  ;;  %v1872_v44 = vpop.f32.mrb[16].mxu1 }
 0x22f   :  { %v1873_v46 = vpop.f32.mrb[17].mxu1 }
 0x230   :  { %v794_v47 = vpack.c.bf16 %v766_v10, %v765_v6  ;;  %v1874_v49 = vadd.f32 %v1873_v46, %v1872_v44  ;;  %v1875_v50 = vpop.f32.mrb[18].mxu1  ;;  %v798_v51 = vpack.c.bf16 %v774_v16, %v773_v15 }
 0x231   :  { %v1876_v53 = vpop.f32.mrb[19].mxu1 }
 0x232   :  { %2261 = vmatmul.mubr.bf16.gmra.mrb[52].mxu0 %v794_v47  ;;  %v697_v54 = vadd.f32 %v1874_v49, %v2808_v52  ;;  %v1877_v55 = vadd.f32 %v1876_v53, %v1875_v50 }
 0x233   :  { %2264 = vmatprep.mubr.bf16.mxu0 %v2814_v48 }
 0x234   :  { %v700_v56 = vadd.f32 %v1877_v55, %v2808_v52  ;;  %v775_v57 = vmax.f32 %v697_v54, 0.0 }
 0x236   :  { %v776_v58 = vmax.f32 %v700_v56, 0.0  ;;  %v1878_v59 = vpop.f32.mrb[20].mxu1 }
 0x237   :  { %v1879_v60 = vpop.f32.mrb[21].mxu1 }
 0x238   :  { %v1880_v61 = vadd.f32 %v1879_v60, %v1878_v59  ;;  %v1881_v62 = vpop.f32.mrb[22].mxu1  ;;  %v799_v0 = vpack.c.bf16 %v776_v58, %v775_v57 }
 0x239   :  { %v1882_v1 = vpop.f32.mrb[23].mxu1 }
 0x23a   :  { %2265 = vmatmul.mubr.bf16.gmra.mrb[56].mxu0 %v796_v7  ;;  %v705_v2 = vadd.f32 %v1880_v61, %v2808_v52  ;;  %v1883_v3 = vadd.f32 %v1882_v1, %v1881_v62 }
 0x23b   :  { %2268 = vmatprep.mubr.bf16.mxu0 %v797_v63 }
 0x23c   :  { %v708_v4 = vadd.f32 %v1883_v3, %v2808_v52  ;;  %v777_v5 = vmax.f32 %v705_v2, 0.0 }
 0x23e   :  { %v778_v6 = vmax.f32 %v708_v4, 0.0  ;;  %v1884_v48 = vpop.f32.mrb[24].mxu1 }
 0x23f   :  { %v1885_v8 = vpop.f32.mrb[25].mxu1 }
 0x240   :  { %v1886_v9 = vadd.f32 %v1885_v8, %v1884_v48  ;;  %v1887_v10 = vpop.f32.mrb[26].mxu1  ;;  %v800_v15 = vpack.c.bf16 %v778_v6, %v777_v5 }
 0x241   :  { %v1888_v16 = vpop.f32.mrb[27].mxu1 }
 0x242   :  { %2269 = vmatmul.mubr.bf16.gmra.mrb[60].mxu0 %v798_v51  ;;  %v713_v44 = vadd.f32 %v1886_v9, %v2808_v52  ;;  %v1889_v46 = vadd.f32 %v1888_v16, %v1887_v10 }
 0x243   :  { %2272 = vmatprep.mubr.bf16.mxu0 %v799_v0 }
 0x244   :  { %v716_v7 = vadd.f32 %v1889_v46, %v2808_v52  ;;  %v779_v47 = vmax.f32 %v713_v44, 0.0 }
 0x246   :  { %v780_v49 = vmax.f32 %v716_v7, 0.0  ;;  %v1890_v63 = vpop.f32.mrb[28].mxu1 }
 0x247   :  { %v1891_v50 = vpop.f32.mrb[29].mxu1 }
 0x248   :  { %v1892_v53 = vadd.f32 %v1891_v50, %v1890_v63  ;;  %v1893_v54 = vpop.f32.mrb[30].mxu1  ;;  %v801_v55 = vpack.c.bf16 %v780_v49, %v779_v47 }
 0x249   :  { %v1894_v56 = vpop.f32.mrb[31].mxu1 }
 0x24a   :  { %v721_v57 = vadd.f32 %v1892_v53, %v2808_v52  ;;  %v1895_v58 = vadd.f32 %v1894_v56, %v1893_v54  ;;  %2273 = vmatmul.mubr.bf16.gmra.mrb[64].mxu0 %v800_v15 }
 0x24b   :  { %2276 = vmatprep.mubr.bf16.mxu0 %v801_v55 }
 0x24c   :  { %v724_v51 = vadd.f32 %v1895_v58, %v2808_v52  ;;  %v781_v59 = vmax.f32 %v721_v57, 0.0 }
 0x24e   :  { %v782_v60 = vmax.f32 %v724_v51, 0.0  ;;  %v1896_v61 = vpop.f32.mrb[32].mxu1 }
 0x24f   :  { %v1897_v62 = vpop.f32.mrb[33].mxu1 }
 0x250   :  { %v802_v0 = vpack.c.bf16 %v782_v60, %v781_v59  ;;  %v1898_v1 = vadd.f32 %v1897_v62, %v1896_v61  ;;  %v1899_v2 = vpop.f32.mrb[34].mxu1 }
 0x251   :  { %v1900_v3 = vpop.f32.mrb[35].mxu1 }
 0x252   :  { %2277 = vmatmul.mubr.bf16.gmra.mrb[68].mxu0 %v802_v0  ;;  %v729_v4 = vadd.f32 %v1898_v1, %v2808_v52  ;;  %v1901_v5 = vadd.f32 %v1900_v3, %v1899_v2 }
 0x254   :  { %v732_v6 = vadd.f32 %v1901_v5, %v2808_v52  ;;  %v783_v48 = vmax.f32 %v729_v4, 0.0 }
 0x256   :  { %v784_v8 = vmax.f32 %v732_v6, 0.0  ;;  %v1902_v9 = vpop.f32.mrb[36].mxu1 }
 0x257   :  { %v1903_v10 = vpop.f32.mrb[37].mxu1 }
 0x258   :  { %v1904_v15 = vadd.f32 %v1903_v10, %v1902_v9  ;;  %v1905_v16 = vpop.f32.mrb[38].mxu1  ;;  %v803_v44 = vpack.c.bf16 %v784_v8, %v783_v48 }
 0x259   :  { %v1906_v46 = vpop.f32.mrb[39].mxu1 }
 0x25a   :  { %v737_v7 = vadd.f32 %v1904_v15, %v2808_v52  ;;  %v1907_v47 = vadd.f32 %v1906_v46, %v1905_v16  ;;  %2280 = vmatprep.mubr.bf16.mxu0 %v803_v44 }
 0x25c   :  { %v740_v49 = vadd.f32 %v1907_v47, %v2808_v52  ;;  %v785_v63 = vmax.f32 %v737_v7, 0.0 }
 0x25e   :  { %v786_v50 = vmax.f32 %v740_v49, 0.0  ;;  %v1908_v53 = vpop.f32.mrb[40].mxu1 }
 0x25f   :  { %v1909_v54 = vpop.f32.mrb[41].mxu1 }
 0x260   :  { %v804_v55 = vpack.c.bf16 %v786_v50, %v785_v63  ;;  %v1910_v56 = vadd.f32 %v1909_v54, %v1908_v53  ;;  %v1911_v57 = vpop.f32.mrb[42].mxu1 }
 0x261   :  { %v1912_v58 = vpop.f32.mrb[43].mxu1 }
 0x262   :  { %2281 = vmatmul.mubr.bf16.gmra.mrb[72].mxu0 %v804_v55  ;;  %v745_v51 = vadd.f32 %v1910_v56, %v2808_v52  ;;  %v1913_v59 = vadd.f32 %v1912_v58, %v1911_v57 }
 0x264   :  { %v748_v60 = vadd.f32 %v1913_v59, %v2808_v52  ;;  %v787_v61 = vmax.f32 %v745_v51, 0.0 }
 0x266   :  { %v788_v62 = vmax.f32 %v748_v60, 0.0  ;;  %v1914_v0 = vpop.f32.mrb[44].mxu1 }
 0x267   :  { %v1915_v1 = vpop.f32.mrb[45].mxu1 }
 0x268   :  { %v1916_v2 = vadd.f32 %v1915_v1, %v1914_v0  ;;  %v1917_v3 = vpop.f32.mrb[46].mxu1  ;;  %v805_v4 = vpack.c.bf16 %v788_v62, %v787_v61 }
 0x269   :  { %v1918_v5 = vpop.f32.mrb[47].mxu1 }
 0x26a   :  { %v753_v6 = vadd.f32 %v1916_v2, %v2808_v52  ;;  %v1919_v48 = vadd.f32 %v1918_v5, %v1917_v3  ;;  %2284 = vmatprep.mubr.bf16.mxu0 %v805_v4 }
 0x26c   :  { %v756_v8 = vadd.f32 %v1919_v48, %v2808_v52  ;;  %v789_v9 = vmax.f32 %v753_v6, 0.0 }
 0x26e   :  { %v790_v10 = vmax.f32 %v756_v8, 0.0 }
 0x270   :  { %v806_v15 = vpack.c.bf16 %v790_v10, %v789_v9 }
 0x272   :  { %2285 = vmatmul.mubr.bf16.gmra.mrb[76].mxu0 %v806_v15 }
 0x273   :  { %1087 = vmatprep.mubr.bf16.mxu0 %v2592_v24 }
 0x2f5   :  { %v2258_v16 = vpop.f32.mrb[48].mxu0 }
 0x2f6   :  { %v905_v44 = vpop.f32.mrb[49].mxu0 }
 0x2f7   :  { %v2259_v46 = vpop.f32.mrb[50].mxu0 }
 0x2f8   :  { %v1033_v7 = vpack.c.bf16 %v2259_v46, %v2258_v16  ;;  %v908_v47 = vpop.f32.mrb[51].mxu0 }
 0x2f9   :  { %v1032_v49 = vpack.c.bf16 %v908_v47, %v905_v44 }
 0x305   :  { %v2262_v63 = vpop.f32.mrb[52].mxu0 }
 0x306   :  { %v921_v50 = vpop.f32.mrb[53].mxu0 }
 0x307   :  { %v2263_v53 = vpop.f32.mrb[54].mxu0 }
 0x308   :  { %v1035_v54 = vpack.c.bf16 %v2263_v53, %v2262_v63  ;;  %v924_v55 = vpop.f32.mrb[55].mxu0 }
 0x309   :  { %v1034_v56 = vpack.c.bf16 %v924_v55, %v921_v50 }
 0x30d   :  { %v2266_v57 = vpop.f32.mrb[56].mxu0 }
 0x30e   :  { %v937_v52 = vpop.f32.mrb[57].mxu0 }
 0x30f   :  { %v2267_v58 = vpop.f32.mrb[58].mxu0 }
 0x310   :  { %v1037_v51 = vpack.c.bf16 %v2267_v58, %v2266_v57  ;;  %v940_v59 = vpop.f32.mrb[59].mxu0 }
 0x311   :  { %v1036_v60 = vpack.c.bf16 %v940_v59, %v937_v52 }
 0x315   :  { %v2270_v61 = vpop.f32.mrb[60].mxu0 }
 0x316   :  { %v953_v24 = vpop.f32.mrb[61].mxu0 }
 0x317   :  { %v2271_v62 = vpop.f32.mrb[62].mxu0 }
 0x318   :  { %v1039_v0 = vpack.c.bf16 %v2271_v62, %v2270_v61  ;;  %v956_v1 = vpop.f32.mrb[63].mxu0 }
 0x319   :  { %v1038_v2 = vpack.c.bf16 %v956_v1, %v953_v24 }
 0x31d   :  { %v2274_v3 = vpop.f32.mrb[64].mxu0 }
 0x31e   :  { %v969_v4 = vpop.f32.mrb[65].mxu0 }
 0x31f   :  { %v2275_v5 = vpop.f32.mrb[66].mxu0 }
 0x320   :  { %v1041_v6 = vpack.c.bf16 %v2275_v5, %v2274_v3  ;;  %v972_v48 = vpop.f32.mrb[67].mxu0 }
 0x321   :  { %v1040_v8 = vpack.c.bf16 %v972_v48, %v969_v4 }
 0x323   :  { %1944 = vmatprep.subr.bf16.mxu0 %v1040_v8 }
 0x324   :  { %1945 = vmatpush3.bf16.msra.mxu0 %v1032_v49 }
 0x325   :  { %v2278_v9 = vpop.f32.mrb[68].mxu0  ;;  %1946 = vmatprep.subr.bf16.mxu0 %v1041_v6 }
 0x326   :  { %v985_v10 = vpop.f32.mrb[69].mxu0 }
 0x327   :  { %v2279_v15 = vpop.f32.mrb[70].mxu0 }
 0x328   :  { %v1043_v16 = vpack.c.bf16 %v2279_v15, %v2278_v9  ;;  %v988_v44 = vpop.f32.mrb[71].mxu0  ;;  %1947 = vmatpush3.bf16.msra.mxu0 %v1033_v7 }
 0x329   :  { %v1042_v46 = vpack.c.bf16 %v988_v44, %v985_v10 }
 0x32b   :  { %1948 = vmatprep.subr.bf16.mxu0 %v1042_v46 }
 0x32c   :  { %1949 = vmatpush3.bf16.msra.mxu0 %v1034_v56  ;;  %v2433_v56 = vld [vmem:[%s3172_s6 + $0x8] sm:$0xff]  }
 0x32d   :  { %1950 = vmatprep.subr.bf16.mxu0 %v1043_v16 }
 0x330   :  { %1951 = vmatpush3.bf16.msra.mxu0 %v1035_v54  ;;  %v2432_v54 = vld [vmem:[%s3172_s6] sm:$0xff]  }
 0x331   :  { %2288 = vmatprep.subr.bf16.mxu1 %v2432_v54 }
 0x332   :  { %2289 = vmatpush3.bf16.msra.mxu1 %v2432_v54 }
 0x333   :  { %2290 = vmatprep.subr.bf16.mxu1 %v2433_v56 }
 0x335   :  { %v2282_v47 = vpop.f32.mrb[72].mxu0 }
 0x336   :  { %v1001_v63 = vpop.f32.mrb[73].mxu0  ;;  %2291 = vmatpush3.bf16.msra.mxu1 %v2433_v56 }
 0x337   :  { %v2283_v50 = vpop.f32.mrb[74].mxu0 }
 0x338   :  { %v1045_v53 = vpack.c.bf16 %v2283_v50, %v2282_v47  ;;  %v1004_v55 = vpop.f32.mrb[75].mxu0 }
 0x339   :  { %v1044_v57 = vpack.c.bf16 %v1004_v55, %v1001_v63 }
 0x33b   :  { %1952 = vmatprep.subr.bf16.mxu0 %v1044_v57 }
 0x33c   :  { %1953 = vmatpush3.bf16.msra.mxu0 %v1036_v60  ;;  %v2435_v60 = vld [vmem:[%s3172_s6 + $0x18] sm:$0xff]  }
 0x33d   :  { %1954 = vmatprep.subr.bf16.mxu0 %v1045_v53 }
 0x340   :  { %1955 = vmatpush3.bf16.msra.mxu0 %v1037_v51  ;;  %v2434_v51 = vld [vmem:[%s3172_s6 + $0x10] sm:$0xff]  }
 0x341   :  { %2292 = vmatprep.subr.bf16.mxu1 %v2434_v51 }
 0x342   :  { %2293 = vmatpush3.bf16.msra.mxu1 %v2434_v51 }
 0x343   :  { %2294 = vmatprep.subr.bf16.mxu1 %v2435_v60 }
 0x345   :  { %v2286_v49 = vpop.f32.mrb[76].mxu0 }
 0x346   :  { %v1017_v52 = vpop.f32.mrb[77].mxu0  ;;  %2295 = vmatpush3.bf16.msra.mxu1 %v2435_v60 }
 0x347   :  { %v2287_v58 = vpop.f32.mrb[78].mxu0 }
 0x348   :  { %v1047_v59 = vpack.c.bf16 %v2287_v58, %v2286_v49  ;;  %v1020_v7 = vpop.f32.mrb[79].mxu0 }
 0x349   :  { %v1046_v61 = vpack.c.bf16 %v1020_v7, %v1017_v52 }
 0x34b   :  { %1956 = vmatprep.subr.bf16.mxu0 %v1046_v61 }
 0x34c   :  { %1957 = vmatpush3.bf16.msra.mxu0 %v1038_v2 }
 0x34d   :  { %1958 = vmatprep.subr.bf16.mxu0 %v1047_v59 }
 0x350   :  { %1959 = vmatpush3.bf16.msra.mxu0 %v1039_v0 }
 0x353   :  { %1088 = vmatmul.mubr.bf16.vlgmr.msra.gmra.mrb[80].mxu0 %v2607_v11  ;;  %v2437_v11 = vld [vmem:[%s3172_s6 + $0x28] sm:$0xff]  }
 0x354   :  { %1095 = vmatprep.mubr.bf16.mxu0 %v2617_v13  ;;  %v2439_v13 = vld [vmem:[%s3172_s6 + $0x38] sm:$0xff]  }
 0x35b   :  { %1096 = vmatmul.mubr.bf16.gmra.mrb[84].mxu0 %v2637_v17  ;;  %v2904_v17 = vld [vmem:[%s3173_s5] ss:$0 sm:$0xff] }
 0x35c   :  { %1103 = vmatprep.mubr.bf16.mxu0 %v2647_v19 }
 0x363   :  { %1104 = vmatmul.mubr.bf16.gmra.mrb[88].mxu0 %v2661_v21 }
 0x364   :  { %1111 = vmatprep.mubr.bf16.mxu0 %v2671_v23 }
 0x36b   :  { %1112 = vmatmul.mubr.bf16.gmra.mrb[92].mxu0 %v2685_v27 }
 0x36c   :  { %1119 = vmatprep.mubr.bf16.mxu0 %v2597_v25  ;;  %v2436_v25 = vld [vmem:[%s3172_s6 + $0x20] sm:$0xff]  }
 0x36d   :  { %2296 = vmatprep.subr.bf16.mxu1 %v2436_v25 }
 0x36e   :  { %2297 = vmatpush3.bf16.msra.mxu1 %v2436_v25 }
 0x36f   :  { %2298 = vmatprep.subr.bf16.mxu1 %v2437_v11 }
 0x372   :  { %2299 = vmatpush3.bf16.msra.mxu1 %v2437_v11 }
 0x373   :  { %1120 = vmatmul.mubr.bf16.gmra.mrb[96].mxu0 %v2612_v12  ;;  %v2438_v12 = vld [vmem:[%s3172_s6 + $0x30] sm:$0xff]  }
 0x374   :  { %1127 = vmatprep.mubr.bf16.mxu0 %v2622_v14  ;;  %2300 = vmatprep.subr.bf16.mxu1 %v2438_v12 }
 0x376   :  { %2301 = vmatpush3.bf16.msra.mxu1 %v2438_v12 }
 0x377   :  { %2302 = vmatprep.subr.bf16.mxu1 %v2439_v13 }
 0x37a   :  { %2303 = vmatpush3.bf16.msra.mxu1 %v2439_v13 }
 0x37b   :  { %1128 = vmatmul.mubr.bf16.gmra.mrb[100].mxu0 %v2642_v18 }
 0x37c   :  { %1135 = vmatprep.mubr.bf16.mxu0 %v2652_v20 }
 0x383   :  { %1136 = vmatmul.mubr.bf16.gmra.mrb[104].mxu0 %v2666_v22 }
 0x384   :  { %1143 = vmatprep.mubr.bf16.mxu0 %v2676_v26 }
 0x38b   :  { %1144 = vmatmul.mubr.bf16.gmra.mrb[108].mxu0 %v2690_v28 }
 0x38c   :  { %1151 = vmatprep.mubr.bf16.mxu0 %v2695_v29 }
 0x393   :  { %1152 = vmatmul.mubr.bf16.gmra.mrb[112].mxu0 %v2703_v30 }
 0x394   :  { %1159 = vmatprep.mubr.bf16.mxu0 %v2708_v31 }
 0x39b   :  { %1160 = vmatmul.mubr.bf16.gmra.mrb[116].mxu0 %v2715_v32 }
 0x39c   :  { %1167 = vmatprep.mubr.bf16.mxu0 %v2720_v33 }
 0x3a3   :  { %1168 = vmatmul.mubr.bf16.gmra.mrb[120].mxu0 %v2727_v34 }
 0x3a4   :  { %1175 = vmatprep.mubr.bf16.mxu0 %v2732_v35 }
 0x3ab   :  { %1176 = vmatmul.mubr.bf16.gmra.mrb[124].mxu0 %v2739_v36 }
 0x3ac   :  { %1183 = vmatprep.mubr.bf16.mxu0 %v2744_v37 }
 0x3b3   :  { %1184 = vmatmul.mubr.bf16.gmra.mrb[128].mxu0 %v2751_v38 }
 0x3b4   :  { %1191 = vmatprep.mubr.bf16.mxu0 %v2756_v39 }
 0x3bb   :  { %1192 = vmatmul.mubr.bf16.gmra.mrb[132].mxu0 %v2763_v40 }
 0x3bc   :  { %1199 = vmatprep.mubr.bf16.mxu0 %v2768_v41 }
 0x3c3   :  { %1200 = vmatmul.mubr.bf16.gmra.mrb[136].mxu0 %v2775_v42 }
 0x3c4   :  { %1207 = vmatprep.mubr.bf16.mxu0 %v2780_v43 }
 0x3cb   :  { %1208 = vmatmul.mubr.bf16.gmra.mrb[140].mxu0 %v2790_v45 }
 0x426   :  { %v1960_v14 = vpop.f32.mrb[80].mxu0 }
 0x427   :  { %v1961_v18 = vpop.f32.mrb[81].mxu0 }
 0x428   :  { %v1962_v19 = vadd.f32 %v1961_v18, %v1960_v14  ;;  %v1963_v20 = vpop.f32.mrb[82].mxu0 }
 0x429   :  { %v1964_v21 = vpop.f32.mrb[83].mxu0 }
 0x42a   :  { %v1090_v22 = vadd.f32 %v1962_v19, %v2904_v17  ;;  %v1965_v23 = vadd.f32 %v1964_v21, %v1963_v20 }
 0x42c   :  { %v1093_v26 = vadd.f32 %v1965_v23, %v2904_v17  ;;  %v1216_v27 = vmax.f32 %v1090_v22, 0.0 }
 0x42e   :  { %v1217_v28 = vmax.f32 %v1093_v26, 0.0  ;;  %v1966_v29 = vpop.f32.mrb[84].mxu0 }
 0x42f   :  { %v1967_v30 = vpop.f32.mrb[85].mxu0 }
 0x430   :  { %v1968_v31 = vadd.f32 %v1967_v30, %v1966_v29  ;;  %v1969_v32 = vpop.f32.mrb[86].mxu0  ;;  %v1248_v33 = vpack.c.bf16 %v1217_v28, %v1216_v27 }
 0x431   :  { %v1970_v34 = vpop.f32.mrb[87].mxu0 }
 0x432   :  { %v1098_v35 = vadd.f32 %v1968_v31, %v2904_v17  ;;  %v1971_v36 = vadd.f32 %v1970_v34, %v1969_v32  ;;  %2304 = vmatprep.mubr.bf16.mxu1 %v1248_v33 }
 0x434   :  { %v1101_v37 = vadd.f32 %v1971_v36, %v2904_v17  ;;  %v1218_v38 = vmax.f32 %v1098_v35, 0.0 }
 0x436   :  { %v1219_v39 = vmax.f32 %v1101_v37, 0.0  ;;  %v1972_v40 = vpop.f32.mrb[88].mxu0 }
 0x437   :  { %v1973_v41 = vpop.f32.mrb[89].mxu0 }
 0x438   :  { %v1249_v42 = vpack.c.bf16 %v1219_v39, %v1218_v38  ;;  %v1974_v43 = vadd.f32 %v1973_v41, %v1972_v40  ;;  %v1975_v45 = vpop.f32.mrb[90].mxu0 }
 0x439   :  { %v1976_v24 = vpop.f32.mrb[91].mxu0 }
 0x43a   :  { %v1106_v62 = vadd.f32 %v1974_v43, %v2904_v17  ;;  %2305 = vmatmul.mubr.bf16.vlgmr.msra.gmra.mrb[48].mxu1 %v1249_v42  ;;  %v1977_v0 = vadd.f32 %v1976_v24, %v1975_v45 }
 0x43c   :  { %v1109_v1 = vadd.f32 %v1977_v0, %v2904_v17  ;;  %v1220_v2 = vmax.f32 %v1106_v62, 0.0 }
 0x43e   :  { %v1221_v3 = vmax.f32 %v1109_v1, 0.0  ;;  %v1978_v4 = vpop.f32.mrb[92].mxu0 }
 0x43f   :  { %v1979_v5 = vpop.f32.mrb[93].mxu0 }
 0x440   :  { %v1980_v6 = vadd.f32 %v1979_v5, %v1978_v4  ;;  %v1981_v48 = vpop.f32.mrb[94].mxu0  ;;  %v1250_v8 = vpack.c.bf16 %v1221_v3, %v1220_v2 }
 0x441   :  { %v1982_v9 = vpop.f32.mrb[95].mxu0 }
 0x442   :  { %v1114_v10 = vadd.f32 %v1980_v6, %v2904_v17  ;;  %v1983_v15 = vadd.f32 %v1982_v9, %v1981_v48  ;;  %2308 = vmatprep.mubr.bf16.mxu1 %v1250_v8 }
 0x444   :  { %v1117_v16 = vadd.f32 %v1983_v15, %v2904_v17  ;;  %v1222_v44 = vmax.f32 %v1114_v10, 0.0 }
 0x446   :  { %v1223_v46 = vmax.f32 %v1117_v16, 0.0  ;;  %v1984_v47 = vpop.f32.mrb[96].mxu0 }
 0x447   :  { %v1985_v63 = vpop.f32.mrb[97].mxu0 }
 0x448   :  { %v1986_v50 = vadd.f32 %v1985_v63, %v1984_v47  ;;  %v1251_v53 = vpack.c.bf16 %v1223_v46, %v1222_v44  ;;  %v1987_v55 = vpop.f32.mrb[98].mxu0 }
 0x449   :  { %v1988_v57 = vpop.f32.mrb[99].mxu0 }
 0x44a   :  { %v1122_v49 = vadd.f32 %v1986_v50, %v2904_v17  ;;  %2309 = vmatmul.mubr.bf16.gmra.mrb[52].mxu1 %v1251_v53  ;;  %v1989_v52 = vadd.f32 %v1988_v57, %v1987_v55 }
 0x44c   :  { %v1125_v58 = vadd.f32 %v1989_v52, %v2904_v17  ;;  %v1224_v59 = vmax.f32 %v1122_v49, 0.0 }
 0x44e   :  { %v1225_v7 = vmax.f32 %v1125_v58, 0.0  ;;  %v1990_v61 = vpop.f32.mrb[100].mxu0 }
 0x44f   :  { %v1991_v54 = vpop.f32.mrb[101].mxu0 }
 0x450   :  { %v1992_v56 = vadd.f32 %v1991_v54, %v1990_v61  ;;  %v1993_v51 = vpop.f32.mrb[102].mxu0  ;;  %v1252_v60 = vpack.c.bf16 %v1225_v7, %v1224_v59 }
 0x451   :  { %v1994_v25 = vpop.f32.mrb[103].mxu0 }
 0x452   :  { %v1130_v11 = vadd.f32 %v1992_v56, %v2904_v17  ;;  %v1995_v12 = vadd.f32 %v1994_v25, %v1993_v51  ;;  %2312 = vmatprep.mubr.bf16.mxu1 %v1252_v60 }
 0x454   :  { %v1133_v13 = vadd.f32 %v1995_v12, %v2904_v17  ;;  %v1226_v14 = vmax.f32 %v1130_v11, 0.0 }
 0x456   :  { %v1227_v18 = vmax.f32 %v1133_v13, 0.0  ;;  %v1996_v19 = vpop.f32.mrb[104].mxu0 }
 0x457   :  { %v1997_v20 = vpop.f32.mrb[105].mxu0 }
 0x458   :  { %v1998_v21 = vadd.f32 %v1997_v20, %v1996_v19  ;;  %v1253_v22 = vpack.c.bf16 %v1227_v18, %v1226_v14  ;;  %v1999_v23 = vpop.f32.mrb[106].mxu0 }
 0x459   :  { %v2000_v26 = vpop.f32.mrb[107].mxu0 }
 0x45a   :  { %v1138_v27 = vadd.f32 %v1998_v21, %v2904_v17  ;;  %2313 = vmatmul.mubr.bf16.gmra.mrb[56].mxu1 %v1253_v22  ;;  %v2001_v28 = vadd.f32 %v2000_v26, %v1999_v23 }
 0x45c   :  { %v1141_v29 = vadd.f32 %v2001_v28, %v2904_v17  ;;  %v1228_v30 = vmax.f32 %v1138_v27, 0.0 }
 0x45e   :  { %v1229_v31 = vmax.f32 %v1141_v29, 0.0  ;;  %v2002_v32 = vpop.f32.mrb[108].mxu0 }
 0x45f   :  { %v2003_v33 = vpop.f32.mrb[109].mxu0 }
 0x460   :  { %v2004_v34 = vadd.f32 %v2003_v33, %v2002_v32  ;;  %v2005_v35 = vpop.f32.mrb[110].mxu0  ;;  %v1254_v36 = vpack.c.bf16 %v1229_v31, %v1228_v30 }
 0x461   :  { %v2006_v37 = vpop.f32.mrb[111].mxu0 }
 0x462   :  { %v1146_v38 = vadd.f32 %v2004_v34, %v2904_v17  ;;  %v2007_v39 = vadd.f32 %v2006_v37, %v2005_v35  ;;  %2316 = vmatprep.mubr.bf16.mxu1 %v1254_v36 }
 0x464   :  { %v1149_v40 = vadd.f32 %v2007_v39, %v2904_v17  ;;  %v1230_v41 = vmax.f32 %v1146_v38, 0.0 }
 0x466   :  { %v1231_v42 = vmax.f32 %v1149_v40, 0.0  ;;  %v2008_v43 = vpop.f32.mrb[112].mxu0 }
 0x467   :  { %v2009_v45 = vpop.f32.mrb[113].mxu0 }
 0x468   :  { %v2010_v24 = vadd.f32 %v2009_v45, %v2008_v43  ;;  %v2011_v62 = vpop.f32.mrb[114].mxu0  ;;  %v1255_v0 = vpack.c.bf16 %v1231_v42, %v1230_v41 }
 0x469   :  { %v2012_v1 = vpop.f32.mrb[115].mxu0 }
 0x46a   :  { %v1154_v2 = vadd.f32 %v2010_v24, %v2904_v17  ;;  %2317 = vmatmul.mubr.bf16.gmra.mrb[60].mxu1 %v1255_v0  ;;  %v2013_v3 = vadd.f32 %v2012_v1, %v2011_v62 }
 0x46c   :  { %v1157_v4 = vadd.f32 %v2013_v3, %v2904_v17  ;;  %v1232_v5 = vmax.f32 %v1154_v2, 0.0 }
 0x46e   :  { %v1233_v6 = vmax.f32 %v1157_v4, 0.0  ;;  %v2014_v48 = vpop.f32.mrb[116].mxu0 }
 0x46f   :  { %v2015_v8 = vpop.f32.mrb[117].mxu0 }
 0x470   :  { %v2016_v9 = vadd.f32 %v2015_v8, %v2014_v48  ;;  %v2017_v10 = vpop.f32.mrb[118].mxu0  ;;  %v1256_v15 = vpack.c.bf16 %v1233_v6, %v1232_v5 }
 0x471   :  { %v2018_v16 = vpop.f32.mrb[119].mxu0 }
 0x472   :  { %v1162_v44 = vadd.f32 %v2016_v9, %v2904_v17  ;;  %v2019_v46 = vadd.f32 %v2018_v16, %v2017_v10  ;;  %2320 = vmatprep.mubr.bf16.mxu1 %v1256_v15 }
 0x474   :  { %v1165_v47 = vadd.f32 %v2019_v46, %v2904_v17  ;;  %v1234_v63 = vmax.f32 %v1162_v44, 0.0 }
 0x476   :  { %v1235_v50 = vmax.f32 %v1165_v47, 0.0  ;;  %v2020_v53 = vpop.f32.mrb[120].mxu0 }
 0x477   :  { %v2021_v55 = vpop.f32.mrb[121].mxu0 }
 0x478   :  { %v1257_v57 = vpack.c.bf16 %v1235_v50, %v1234_v63  ;;  %v2022_v49 = vadd.f32 %v2021_v55, %v2020_v53  ;;  %v2023_v52 = vpop.f32.mrb[122].mxu0 }
 0x479   :  { %v2024_v58 = vpop.f32.mrb[123].mxu0 }
 0x47a   :  { %2321 = vmatmul.mubr.bf16.gmra.mrb[64].mxu1 %v1257_v57  ;;  %v1170_v59 = vadd.f32 %v2022_v49, %v2904_v17  ;;  %v2025_v7 = vadd.f32 %v2024_v58, %v2023_v52  ;;  %v2440_v52 = vld [vmem:[%s3169_s0 + $0x4] ss:$8 sps:$4 sm:$0xff]  }
 0x47c   :  { %v1173_v61 = vadd.f32 %v2025_v7, %v2904_v17  ;;  %v1236_v54 = vmax.f32 %v1170_v59, 0.0 }
 0x47e   :  { %v1237_v56 = vmax.f32 %v1173_v61, 0.0  ;;  %v2026_v51 = vpop.f32.mrb[124].mxu0 }
 0x47f   :  { %v2027_v60 = vpop.f32.mrb[125].mxu0 }
 0x480   :  { %v2028_v25 = vadd.f32 %v2027_v60, %v2026_v51  ;;  %v2029_v11 = vpop.f32.mrb[126].mxu0  ;;  %v1258_v12 = vpack.c.bf16 %v1237_v56, %v1236_v54 }
 0x481   :  { %v2030_v13 = vpop.f32.mrb[127].mxu0 }
 0x482   :  { %v1178_v14 = vadd.f32 %v2028_v25, %v2904_v17  ;;  %v2031_v18 = vadd.f32 %v2030_v13, %v2029_v11  ;;  %2324 = vmatprep.mubr.bf16.mxu1 %v1258_v12 }
 0x484   :  { %v1181_v19 = vadd.f32 %v2031_v18, %v2904_v17  ;;  %v1238_v20 = vmax.f32 %v1178_v14, 0.0 }
 0x486   :  { %v1239_v21 = vmax.f32 %v1181_v19, 0.0  ;;  %v2032_v22 = vpop.f32.mrb[128].mxu0 }
 0x487   :  { %v2033_v23 = vpop.f32.mrb[129].mxu0 }
 0x488   :  { %v1259_v26 = vpack.c.bf16 %v1239_v21, %v1238_v20  ;;  %v2034_v27 = vadd.f32 %v2033_v23, %v2032_v22  ;;  %v2035_v28 = vpop.f32.mrb[130].mxu0 }
 0x489   :  { %v2036_v29 = vpop.f32.mrb[131].mxu0 }
 0x48a   :  { %2325 = vmatmul.mubr.bf16.gmra.mrb[68].mxu1 %v1259_v26  ;;  %v1186_v30 = vadd.f32 %v2034_v27, %v2904_v17  ;;  %v2037_v31 = vadd.f32 %v2036_v29, %v2035_v28 }
 0x48c   :  { %v1189_v32 = vadd.f32 %v2037_v31, %v2904_v17  ;;  %v1240_v33 = vmax.f32 %v1186_v30, 0.0 }
 0x48e   :  { %v1241_v34 = vmax.f32 %v1189_v32, 0.0  ;;  %v2038_v35 = vpop.f32.mrb[132].mxu0 }
 0x48f   :  { %v2039_v36 = vpop.f32.mrb[133].mxu0 }
 0x490   :  { %v2040_v37 = vadd.f32 %v2039_v36, %v2038_v35  ;;  %v2041_v38 = vpop.f32.mrb[134].mxu0  ;;  %v1260_v39 = vpack.c.bf16 %v1241_v34, %v1240_v33 }
 0x491   :  { %v2042_v40 = vpop.f32.mrb[135].mxu0 }
 0x492   :  { %v1194_v41 = vadd.f32 %v2040_v37, %v2904_v17  ;;  %v2043_v42 = vadd.f32 %v2042_v40, %v2041_v38  ;;  %2328 = vmatprep.mubr.bf16.mxu1 %v1260_v39 }
 0x494   :  { %v1197_v43 = vadd.f32 %v2043_v42, %v2904_v17  ;;  %v1242_v45 = vmax.f32 %v1194_v41, 0.0 }
 0x496   :  { %v1243_v24 = vmax.f32 %v1197_v43, 0.0  ;;  %v2044_v62 = vpop.f32.mrb[136].mxu0 }
 0x497   :  { %v2045_v0 = vpop.f32.mrb[137].mxu0 }
 0x498   :  { %v1261_v1 = vpack.c.bf16 %v1243_v24, %v1242_v45  ;;  %v2046_v2 = vadd.f32 %v2045_v0, %v2044_v62  ;;  %v2047_v3 = vpop.f32.mrb[138].mxu0 }
 0x499   :  { %v2048_v4 = vpop.f32.mrb[139].mxu0 }
 0x49a   :  { %2329 = vmatmul.mubr.bf16.gmra.mrb[72].mxu1 %v1261_v1  ;;  %v1202_v5 = vadd.f32 %v2046_v2, %v2904_v17  ;;  %v2049_v6 = vadd.f32 %v2048_v4, %v2047_v3 }
 0x49c   :  { %v1205_v48 = vadd.f32 %v2049_v6, %v2904_v17  ;;  %v1244_v8 = vmax.f32 %v1202_v5, 0.0 }
 0x49e   :  { %v1245_v9 = vmax.f32 %v1205_v48, 0.0  ;;  %v2050_v10 = vpop.f32.mrb[140].mxu0  ;;  %v2441_v48 = vld [vmem:[%s3169_s0] ss:$8 sps:$4 sm:$0xff]  }
 0x49f   :  { %v2051_v15 = vpop.f32.mrb[141].mxu0 }
 0x4a0   :  { %v2052_v16 = vadd.f32 %v2051_v15, %v2050_v10  ;;  %v2053_v44 = vpop.f32.mrb[142].mxu0  ;;  %v1262_v46 = vpack.c.bf16 %v1245_v9, %v1244_v8  ;;  %v2442_v8 = vld [vmem:[%s3169_s0 + $0x14] ss:$8 sps:$4 sm:$0xff]   ;;  %v2443_v9 = vld [vmem:[%s3169_s0 + $0x10] ss:$8 sps:$4 sm:$0xff]  }
 0x4a1   :  { %v2054_v47 = vpop.f32.mrb[143].mxu0  ;;  %v2444_v10 = vld [vmem:[%s3169_s0 + $0x24] ss:$8 sps:$4 sm:$0xff]   ;;  %v2445_v15 = vld [vmem:[%s3169_s0 + $0x20] ss:$8 sps:$4 sm:$0xff]  }
 0x4a2   :  { %v1210_v63 = vadd.f32 %v2052_v16, %v2904_v17  ;;  %v2055_v50 = vadd.f32 %v2054_v47, %v2053_v44  ;;  %2332 = vmatprep.mubr.bf16.mxu1 %v1262_v46  ;;  %v2446_v16 = vld [vmem:[%s3169_s0 + $0x34] ss:$8 sps:$4 sm:$0xff]   ;;  %v2447_v44 = vld [vmem:[%s3169_s0 + $0x30] ss:$8 sps:$4 sm:$0xff]   ;;  %v2448_v46 = vld [vmem:[%s3169_s0 + $0x44] ss:$8 sps:$4 sm:$0xff]  }
 0x4a3   :  { %v2449_v47 = vld [vmem:[%s3169_s0 + $0x40] ss:$8 sps:$4 sm:$0xff]  }
 0x4a4   :  { %v1213_v53 = vadd.f32 %v2055_v50, %v2904_v17  ;;  %v1246_v55 = vmax.f32 %v1210_v63, 0.0  ;;  %v2450_v63 = vld [vmem:[%s3169_s0 + $0x54] ss:$8 sps:$4 sm:$0xff]   ;;  %v2451_v50 = vld [vmem:[%s3169_s0 + $0x50] ss:$8 sps:$4 sm:$0xff]  }
 0x4a6   :  { %v1247_v57 = vmax.f32 %v1213_v53, 0.0  ;;  %v2452_v53 = vld [vmem:[%s3169_s0 + $0x64] ss:$8 sps:$4 sm:$0xff]  }
 0x4a8   :  { %v1263_v49 = vpack.c.bf16 %v1247_v57, %v1246_v55  ;;  %v2453_v55 = vld [vmem:[%s3169_s0 + $0x60] ss:$8 sps:$4 sm:$0xff]   ;;  %v2454_v57 = vld [vmem:[%s3169_s0 + $0x74] ss:$8 sps:$4 sm:$0xff]  }
 0x4aa   :  { %2333 = vmatmul.mubr.bf16.gmra.mrb[76].mxu1 %v1263_v49  ;;  %v2455_v49 = vld [vmem:[%s3169_s0 + $0x70] ss:$8 sps:$4 sm:$0xff]  }
 0x4ab   :  { %1544 = vmatprep.mubr.bf16.mxu1 %v2440_v52  ;;  %v2456_v52 = vld [vmem:[%s3169_s0 + $0x84] ss:$8 sps:$4 sm:$0xff]  }
 0x50d   :  { %v2306_v58 = vpop.f32.mrb[48].mxu1 }
 0x50e   :  { %v1362_v59 = vpop.f32.mrb[49].mxu1 }
 0x50f   :  { %v2307_v7 = vpop.f32.mrb[50].mxu1 }
 0x510   :  { %v1490_v61 = vpack.c.bf16 %v2307_v7, %v2306_v58  ;;  %v1365_v54 = vpop.f32.mrb[51].mxu1  ;;  %v2457_v58 = vld [vmem:[%s3169_s0 + $0x80] ss:$8 sps:$4 sm:$0xff]   ;;  %v2459_v7 = vld [vmem:[%s3169_s0 + $0x90] ss:$8 sps:$4 sm:$0xff]  }
 0x511   :  { %v1489_v56 = vpack.c.bf16 %v1365_v54, %v1362_v59  ;;  %v2458_v59 = vld [vmem:[%s3169_s0 + $0x94] ss:$8 sps:$4 sm:$0xff]   ;;  %v2461_v54 = vld [vmem:[%s3169_s0 + $0xa0] ss:$8 sps:$4 sm:$0xff]  }
 0x51d   :  { %v2310_v51 = vpop.f32.mrb[52].mxu1 }
 0x51e   :  { %v1378_v60 = vpop.f32.mrb[53].mxu1 }
 0x51f   :  { %v2311_v25 = vpop.f32.mrb[54].mxu1 }
 0x520   :  { %v1492_v11 = vpack.c.bf16 %v2311_v25, %v2310_v51  ;;  %v1381_v17 = vpop.f32.mrb[55].mxu1  ;;  %v2463_v51 = vld [vmem:[%s3169_s0 + $0xb0] ss:$8 sps:$4 sm:$0xff]   ;;  %v2465_v25 = vld [vmem:[%s3169_s0 + $0xc0] ss:$8 sps:$4 sm:$0xff]  }
 0x521   :  { %v1491_v12 = vpack.c.bf16 %v1381_v17, %v1378_v60  ;;  %v2464_v60 = vld [vmem:[%s3169_s0 + $0xc4] ss:$8 sps:$4 sm:$0xff]   ;;  %v2467_v17 = vld [vmem:[%s3169_s0 + $0xd0] ss:$8 sps:$4 sm:$0xff]  }
 0x52d   :  { %v2314_v13 = vpop.f32.mrb[56].mxu1 }
 0x52e   :  { %v1394_v14 = vpop.f32.mrb[57].mxu1 }
 0x52f   :  { %v2315_v18 = vpop.f32.mrb[58].mxu1 }
 0x530   :  { %v1494_v19 = vpack.c.bf16 %v2315_v18, %v2314_v13  ;;  %v1397_v20 = vpop.f32.mrb[59].mxu1  ;;  %v2469_v13 = vld [vmem:[%s3169_s0 + $0xe0] ss:$8 sps:$4 sm:$0xff]   ;;  %v2471_v18 = vld [vmem:[%s3169_s0 + $0xf0] ss:$8 sps:$4 sm:$0xff]  }
 0x531   :  { %v1493_v21 = vpack.c.bf16 %v1397_v20, %v1394_v14  ;;  %v2470_v14 = vld [vmem:[%s3169_s0 + $0xf4] ss:$8 sps:$4 sm:$0xff]   ;;  %v3037_v20 = vld [vmem:[%s3174_s7] ss:$0 sm:$0xff] }
 0x53d   :  { %v2318_v22 = vpop.f32.mrb[60].mxu1 }
 0x53e   :  { %v1410_v23 = vpop.f32.mrb[61].mxu1 }
 0x53f   :  { %v2319_v26 = vpop.f32.mrb[62].mxu1 }
 0x540   :  { %v1496_v27 = vpack.c.bf16 %v2319_v26, %v2318_v22  ;;  %v1413_v28 = vpop.f32.mrb[63].mxu1 }
 0x541   :  { %v1495_v29 = vpack.c.bf16 %v1413_v28, %v1410_v23 }
 0x54d   :  { %v2322_v30 = vpop.f32.mrb[64].mxu1 }
 0x54e   :  { %v1426_v31 = vpop.f32.mrb[65].mxu1 }
 0x54f   :  { %v2323_v32 = vpop.f32.mrb[66].mxu1 }
 0x550   :  { %v1498_v33 = vpack.c.bf16 %v2323_v32, %v2322_v30  ;;  %v1429_v34 = vpop.f32.mrb[67].mxu1 }
 0x551   :  { %v1497_v35 = vpack.c.bf16 %v1429_v34, %v1426_v31 }
 0x553   :  { %2080 = vmatprep.subr.bf16.mxu1 %v1497_v35 }
 0x554   :  { %2081 = vmatpush3.bf16.msra.mxu1 %v1489_v56  ;;  %v2462_v56 = vld [vmem:[%s3169_s0 + $0xb4] ss:$8 sps:$4 sm:$0xff]  }
 0x555   :  { %2082 = vmatprep.subr.bf16.mxu1 %v1498_v33 }
 0x558   :  { %2083 = vmatpush3.bf16.msra.mxu1 %v1490_v61  ;;  %v2460_v61 = vld [vmem:[%s3169_s0 + $0xa4] ss:$8 sps:$4 sm:$0xff]  }
 0x55d   :  { %v2326_v36 = vpop.f32.mrb[68].mxu1 }
 0x55e   :  { %v1442_v37 = vpop.f32.mrb[69].mxu1 }
 0x55f   :  { %v2327_v38 = vpop.f32.mrb[70].mxu1 }
 0x560   :  { %v1500_v39 = vpack.c.bf16 %v2327_v38, %v2326_v36  ;;  %v1445_v40 = vpop.f32.mrb[71].mxu1 }
 0x561   :  { %v1499_v41 = vpack.c.bf16 %v1445_v40, %v1442_v37 }
 0x563   :  { %2084 = vmatprep.subr.bf16.mxu1 %v1499_v41 }
 0x564   :  { %2085 = vmatpush3.bf16.msra.mxu1 %v1491_v12  ;;  %v2468_v12 = vld [vmem:[%s3169_s0 + $0xe4] ss:$8 sps:$4 sm:$0xff]  }
 0x565   :  { %2086 = vmatprep.subr.bf16.mxu1 %v1500_v39 }
 0x568   :  { %2087 = vmatpush3.bf16.msra.mxu1 %v1492_v11  ;;  %v2466_v11 = vld [vmem:[%s3169_s0 + $0xd4] ss:$8 sps:$4 sm:$0xff]  }
 0x56d   :  { %v2330_v42 = vpop.f32.mrb[72].mxu1 }
 0x56e   :  { %v1458_v43 = vpop.f32.mrb[73].mxu1 }
 0x56f   :  { %v2331_v45 = vpop.f32.mrb[74].mxu1 }
 0x570   :  { %v1502_v24 = vpack.c.bf16 %v2331_v45, %v2330_v42  ;;  %v1461_v62 = vpop.f32.mrb[75].mxu1 }
 0x571   :  { %v1501_v0 = vpack.c.bf16 %v1461_v62, %v1458_v43 }
 0x573   :  { %2088 = vmatprep.subr.bf16.mxu1 %v1501_v0 }
 0x574   :  { %2089 = vmatpush3.bf16.msra.mxu1 %v1493_v21 }
 0x575   :  { %2090 = vmatprep.subr.bf16.mxu1 %v1502_v24 }
 0x578   :  { %2091 = vmatpush3.bf16.msra.mxu1 %v1494_v19 }
 0x57d   :  { %v2334_v1 = vpop.f32.mrb[76].mxu1 }
 0x57e   :  { %v1474_v2 = vpop.f32.mrb[77].mxu1 }
 0x57f   :  { %v2335_v3 = vpop.f32.mrb[78].mxu1 }
 0x580   :  { %v1504_v4 = vpack.c.bf16 %v2335_v3, %v2334_v1  ;;  %v1477_v5 = vpop.f32.mrb[79].mxu1 }
 0x581   :  { %v1503_v6 = vpack.c.bf16 %v1477_v5, %v1474_v2 }
 0x583   :  { %2092 = vmatprep.subr.bf16.mxu1 %v1503_v6 }
 0x584   :  { %2093 = vmatpush3.bf16.msra.mxu1 %v1495_v29 }
 0x585   :  { %2094 = vmatprep.subr.bf16.mxu1 %v1504_v4 }
 0x588   :  { %2095 = vmatpush3.bf16.msra.mxu1 %v1496_v27 }
 0x58b   :  { %1545 = vmatmul.mubr.bf16.vlgmr.msra.gmra.mrb[80].mxu1 %v2441_v48 }
 0x58c   :  { %1552 = vmatprep.mubr.bf16.mxu1 %v2442_v8 }
 0x593   :  { %1553 = vmatmul.mubr.bf16.gmra.mrb[84].mxu1 %v2443_v9 }
 0x594   :  { %1560 = vmatprep.mubr.bf16.mxu1 %v2444_v10 }
 0x59b   :  { %1561 = vmatmul.mubr.bf16.gmra.mrb[88].mxu1 %v2445_v15 }
 0x59c   :  { %1568 = vmatprep.mubr.bf16.mxu1 %v2446_v16 }
 0x5a3   :  { %1569 = vmatmul.mubr.bf16.gmra.mrb[92].mxu1 %v2447_v44 }
 0x5a4   :  { %1576 = vmatprep.mubr.bf16.mxu1 %v2448_v46 }
 0x5ab   :  { %1577 = vmatmul.mubr.bf16.gmra.mrb[96].mxu1 %v2449_v47 }
 0x5ac   :  { %1584 = vmatprep.mubr.bf16.mxu1 %v2450_v63 }
 0x5b3   :  { %1585 = vmatmul.mubr.bf16.gmra.mrb[100].mxu1 %v2451_v50 }
 0x5b4   :  { %1592 = vmatprep.mubr.bf16.mxu1 %v2452_v53 }
 0x5bb   :  { %1593 = vmatmul.mubr.bf16.gmra.mrb[104].mxu1 %v2453_v55 }
 0x5bc   :  { %1600 = vmatprep.mubr.bf16.mxu1 %v2454_v57 }
 0x5c3   :  { %1601 = vmatmul.mubr.bf16.gmra.mrb[108].mxu1 %v2455_v49 }
 0x5c4   :  { %1608 = vmatprep.mubr.bf16.mxu1 %v2456_v52 }
 0x5cb   :  { %1609 = vmatmul.mubr.bf16.gmra.mrb[112].mxu1 %v2457_v58 }
 0x5cc   :  { %1616 = vmatprep.mubr.bf16.mxu1 %v2458_v59 }
 0x5d3   :  { %1617 = vmatmul.mubr.bf16.gmra.mrb[116].mxu1 %v2459_v7 }
 0x5d4   :  { %1624 = vmatprep.mubr.bf16.mxu1 %v2460_v61 }
 0x5db   :  { %1625 = vmatmul.mubr.bf16.gmra.mrb[120].mxu1 %v2461_v54 }
 0x5dc   :  { %1632 = vmatprep.mubr.bf16.mxu1 %v2462_v56 }
 0x5e3   :  { %1633 = vmatmul.mubr.bf16.gmra.mrb[124].mxu1 %v2463_v51 }
 0x5e4   :  { %1640 = vmatprep.mubr.bf16.mxu1 %v2464_v60 }
 0x5eb   :  { %1641 = vmatmul.mubr.bf16.gmra.mrb[128].mxu1 %v2465_v25 }
 0x5ec   :  { %1648 = vmatprep.mubr.bf16.mxu1 %v2466_v11 }
 0x5f3   :  { %1649 = vmatmul.mubr.bf16.gmra.mrb[132].mxu1 %v2467_v17 }
 0x5f4   :  { %1656 = vmatprep.mubr.bf16.mxu1 %v2468_v12 }
 0x5fb   :  { %1657 = vmatmul.mubr.bf16.gmra.mrb[136].mxu1 %v2469_v13 }
 0x5fc   :  { %1664 = vmatprep.mubr.bf16.mxu1 %v2470_v14 }
 0x603   :  { %1665 = vmatmul.mubr.bf16.gmra.mrb[140].mxu1 %v2471_v18 }
 0x65e   :  { %v2096_v19 = vpop.f32.mrb[80].mxu1 }
 0x65f   :  { %v2097_v21 = vpop.f32.mrb[81].mxu1 }
 0x660   :  { %v2098_v22 = vadd.f32 %v2097_v21, %v2096_v19  ;;  %v2099_v23 = vpop.f32.mrb[82].mxu1 }
 0x661   :  { %v2100_v26 = vpop.f32.mrb[83].mxu1 }
 0x662   :  { %v1547_v27 = vadd.f32 %v2098_v22, %v3037_v20  ;;  %v2101_v28 = vadd.f32 %v2100_v26, %v2099_v23 }
 0x664   :  { %1673 = vst [vmem:[%s3175_s8] sm:$0xff] %v1547_v27  ;;  %v1550_v29 = vadd.f32 %v2101_v28, %v3037_v20 }
 0x666   :  { %1674 = vst [vmem:[%s3175_s8 + $0x8] sm:$0xff] %v1550_v29  ;;  %v2102_v30 = vpop.f32.mrb[84].mxu1 }
 0x667   :  { %v2103_v31 = vpop.f32.mrb[85].mxu1 }
 0x668   :  { %v2104_v32 = vadd.f32 %v2103_v31, %v2102_v30  ;;  %v2105_v33 = vpop.f32.mrb[86].mxu1 }
 0x669   :  { %v2106_v34 = vpop.f32.mrb[87].mxu1 }
 0x66a   :  { %v1555_v35 = vadd.f32 %v2104_v32, %v3037_v20  ;;  %v2107_v36 = vadd.f32 %v2106_v34, %v2105_v33 }
 0x66c   :  { %1675 = vst [vmem:[%s3175_s8 + $0x10] sm:$0xff] %v1555_v35  ;;  %v1558_v37 = vadd.f32 %v2107_v36, %v3037_v20 }
 0x66e   :  { %1676 = vst [vmem:[%s3175_s8 + $0x18] sm:$0xff] %v1558_v37  ;;  %v2108_v38 = vpop.f32.mrb[88].mxu1 }
 0x66f   :  { %v2109_v39 = vpop.f32.mrb[89].mxu1 }
 0x670   :  { %v2110_v40 = vadd.f32 %v2109_v39, %v2108_v38  ;;  %v2111_v41 = vpop.f32.mrb[90].mxu1 }
 0x671   :  { %v2112_v42 = vpop.f32.mrb[91].mxu1 }
 0x672   :  { %v1563_v43 = vadd.f32 %v2110_v40, %v3037_v20  ;;  %v2113_v45 = vadd.f32 %v2112_v42, %v2111_v41 }
 0x674   :  { %1677 = vst [vmem:[%s3175_s8 + $0x20] sm:$0xff] %v1563_v43  ;;  %v1566_v24 = vadd.f32 %v2113_v45, %v3037_v20 }
 0x676   :  { %1678 = vst [vmem:[%s3175_s8 + $0x28] sm:$0xff] %v1566_v24  ;;  %v2114_v62 = vpop.f32.mrb[92].mxu1 }
 0x677   :  { %v2115_v0 = vpop.f32.mrb[93].mxu1 }
 0x678   :  { %v2116_v1 = vadd.f32 %v2115_v0, %v2114_v62  ;;  %v2117_v2 = vpop.f32.mrb[94].mxu1 }
 0x679   :  { %v2118_v3 = vpop.f32.mrb[95].mxu1 }
 0x67a   :  { %v1571_v4 = vadd.f32 %v2116_v1, %v3037_v20  ;;  %v2119_v5 = vadd.f32 %v2118_v3, %v2117_v2 }
 0x67c   :  { %1679 = vst [vmem:[%s3175_s8 + $0x30] sm:$0xff] %v1571_v4  ;;  %v1574_v6 = vadd.f32 %v2119_v5, %v3037_v20 }
 0x67e   :  { %1680 = vst [vmem:[%s3175_s8 + $0x38] sm:$0xff] %v1574_v6  ;;  %v2120_v48 = vpop.f32.mrb[96].mxu1 }
 0x67f   :  { %v2121_v8 = vpop.f32.mrb[97].mxu1 }
 0x680   :  { %v2122_v9 = vadd.f32 %v2121_v8, %v2120_v48  ;;  %v2123_v10 = vpop.f32.mrb[98].mxu1 }
 0x681   :  { %v2124_v15 = vpop.f32.mrb[99].mxu1 }
 0x682   :  { %v1579_v16 = vadd.f32 %v2122_v9, %v3037_v20  ;;  %v2125_v44 = vadd.f32 %v2124_v15, %v2123_v10 }
 0x684   :  { %1681 = vst [vmem:[%s3175_s8 + $0x40] sm:$0xff] %v1579_v16  ;;  %v1582_v46 = vadd.f32 %v2125_v44, %v3037_v20 }
 0x686   :  { %1682 = vst [vmem:[%s3175_s8 + $0x48] sm:$0xff] %v1582_v46  ;;  %v2126_v47 = vpop.f32.mrb[100].mxu1 }
 0x687   :  { %v2127_v63 = vpop.f32.mrb[101].mxu1 }
 0x688   :  { %v2128_v50 = vadd.f32 %v2127_v63, %v2126_v47  ;;  %v2129_v53 = vpop.f32.mrb[102].mxu1 }
 0x689   :  { %v2130_v55 = vpop.f32.mrb[103].mxu1 }
 0x68a   :  { %v1587_v57 = vadd.f32 %v2128_v50, %v3037_v20  ;;  %v2131_v49 = vadd.f32 %v2130_v55, %v2129_v53 }
 0x68c   :  { %1683 = vst [vmem:[%s3175_s8 + $0x50] sm:$0xff] %v1587_v57  ;;  %v1590_v52 = vadd.f32 %v2131_v49, %v3037_v20 }
 0x68e   :  { %1684 = vst [vmem:[%s3175_s8 + $0x58] sm:$0xff] %v1590_v52  ;;  %v2132_v58 = vpop.f32.mrb[104].mxu1 }
 0x68f   :  { %v2133_v59 = vpop.f32.mrb[105].mxu1 }
 0x690   :  { %v2134_v7 = vadd.f32 %v2133_v59, %v2132_v58  ;;  %v2135_v61 = vpop.f32.mrb[106].mxu1 }
 0x691   :  { %v2136_v54 = vpop.f32.mrb[107].mxu1 }
 0x692   :  { %v1595_v56 = vadd.f32 %v2134_v7, %v3037_v20  ;;  %v2137_v51 = vadd.f32 %v2136_v54, %v2135_v61 }
 0x694   :  { %1685 = vst [vmem:[%s3175_s8 + $0x60] sm:$0xff] %v1595_v56  ;;  %v1598_v60 = vadd.f32 %v2137_v51, %v3037_v20 }
 0x696   :  { %1686 = vst [vmem:[%s3175_s8 + $0x68] sm:$0xff] %v1598_v60  ;;  %v2138_v25 = vpop.f32.mrb[108].mxu1 }
 0x697   :  { %v2139_v11 = vpop.f32.mrb[109].mxu1 }
 0x698   :  { %v2140_v17 = vadd.f32 %v2139_v11, %v2138_v25  ;;  %v2141_v12 = vpop.f32.mrb[110].mxu1 }
 0x699   :  { %v2142_v13 = vpop.f32.mrb[111].mxu1 }
 0x69a   :  { %v1603_v14 = vadd.f32 %v2140_v17, %v3037_v20  ;;  %v2143_v18 = vadd.f32 %v2142_v13, %v2141_v12 }
 0x69c   :  { %1687 = vst [vmem:[%s3175_s8 + $0x70] sm:$0xff] %v1603_v14  ;;  %v1606_v19 = vadd.f32 %v2143_v18, %v3037_v20 }
 0x69e   :  { %1688 = vst [vmem:[%s3175_s8 + $0x78] sm:$0xff] %v1606_v19  ;;  %v2144_v21 = vpop.f32.mrb[112].mxu1 }
 0x69f   :  { %v2145_v22 = vpop.f32.mrb[113].mxu1 }
 0x6a0   :  { %v2146_v23 = vadd.f32 %v2145_v22, %v2144_v21  ;;  %v2147_v26 = vpop.f32.mrb[114].mxu1 }
 0x6a1   :  { %v2148_v27 = vpop.f32.mrb[115].mxu1 }
 0x6a2   :  { %v1611_v28 = vadd.f32 %v2146_v23, %v3037_v20  ;;  %v2149_v29 = vadd.f32 %v2148_v27, %v2147_v26 }
 0x6a4   :  { %1689 = vst [vmem:[%s3175_s8 + $0x80] sm:$0xff] %v1611_v28  ;;  %v1614_v30 = vadd.f32 %v2149_v29, %v3037_v20 }
 0x6a6   :  { %1690 = vst [vmem:[%s3175_s8 + $0x88] sm:$0xff] %v1614_v30  ;;  %v2150_v31 = vpop.f32.mrb[116].mxu1 }
 0x6a7   :  { %v2151_v32 = vpop.f32.mrb[117].mxu1 }
 0x6a8   :  { %v2152_v33 = vadd.f32 %v2151_v32, %v2150_v31  ;;  %v2153_v34 = vpop.f32.mrb[118].mxu1 }
 0x6a9   :  { %v2154_v35 = vpop.f32.mrb[119].mxu1 }
 0x6aa   :  { %v1619_v36 = vadd.f32 %v2152_v33, %v3037_v20  ;;  %v2155_v37 = vadd.f32 %v2154_v35, %v2153_v34 }
 0x6ac   :  { %1691 = vst [vmem:[%s3175_s8 + $0x90] sm:$0xff] %v1619_v36  ;;  %v1622_v38 = vadd.f32 %v2155_v37, %v3037_v20 }
 0x6ae   :  { %1692 = vst [vmem:[%s3175_s8 + $0x98] sm:$0xff] %v1622_v38  ;;  %v2156_v39 = vpop.f32.mrb[120].mxu1 }
 0x6af   :  { %v2157_v40 = vpop.f32.mrb[121].mxu1 }
 0x6b0   :  { %v2158_v41 = vadd.f32 %v2157_v40, %v2156_v39  ;;  %v2159_v42 = vpop.f32.mrb[122].mxu1 }
 0x6b1   :  { %v2160_v43 = vpop.f32.mrb[123].mxu1 }
 0x6b2   :  { %v1627_v45 = vadd.f32 %v2158_v41, %v3037_v20  ;;  %v2161_v24 = vadd.f32 %v2160_v43, %v2159_v42 }
 0x6b4   :  { %1693 = vst [vmem:[%s3175_s8 + $0xa0] sm:$0xff] %v1627_v45  ;;  %v1630_v62 = vadd.f32 %v2161_v24, %v3037_v20 }
 0x6b6   :  { %1694 = vst [vmem:[%s3175_s8 + $0xa8] sm:$0xff] %v1630_v62  ;;  %v2162_v0 = vpop.f32.mrb[124].mxu1 }
 0x6b7   :  { %v2163_v1 = vpop.f32.mrb[125].mxu1 }
 0x6b8   :  { %v2164_v2 = vadd.f32 %v2163_v1, %v2162_v0  ;;  %v2165_v3 = vpop.f32.mrb[126].mxu1 }
 0x6b9   :  { %v2166_v4 = vpop.f32.mrb[127].mxu1 }
 0x6ba   :  { %v1635_v5 = vadd.f32 %v2164_v2, %v3037_v20  ;;  %v2167_v6 = vadd.f32 %v2166_v4, %v2165_v3 }
 0x6bc   :  { %1695 = vst [vmem:[%s3175_s8 + $0xb0] sm:$0xff] %v1635_v5  ;;  %v1638_v48 = vadd.f32 %v2167_v6, %v3037_v20 }
 0x6be   :  { %1696 = vst [vmem:[%s3175_s8 + $0xb8] sm:$0xff] %v1638_v48  ;;  %v2168_v8 = vpop.f32.mrb[128].mxu1 }
 0x6bf   :  { %v2169_v9 = vpop.f32.mrb[129].mxu1 }
 0x6c0   :  { %v2170_v10 = vadd.f32 %v2169_v9, %v2168_v8  ;;  %v2171_v15 = vpop.f32.mrb[130].mxu1 }
 0x6c1   :  { %v2172_v16 = vpop.f32.mrb[131].mxu1 }
 0x6c2   :  { %v1643_v44 = vadd.f32 %v2170_v10, %v3037_v20  ;;  %v2173_v46 = vadd.f32 %v2172_v16, %v2171_v15 }
 0x6c4   :  { %1697 = vst [vmem:[%s3175_s8 + $0xc0] sm:$0xff] %v1643_v44  ;;  %v1646_v47 = vadd.f32 %v2173_v46, %v3037_v20 }
 0x6c6   :  { %1698 = vst [vmem:[%s3175_s8 + $0xc8] sm:$0xff] %v1646_v47  ;;  %v2174_v63 = vpop.f32.mrb[132].mxu1 }
 0x6c7   :  { %v2175_v50 = vpop.f32.mrb[133].mxu1 }
 0x6c8   :  { %v2176_v53 = vadd.f32 %v2175_v50, %v2174_v63  ;;  %v2177_v55 = vpop.f32.mrb[134].mxu1 }
 0x6c9   :  { %v2178_v57 = vpop.f32.mrb[135].mxu1 }
 0x6ca   :  { %v1651_v49 = vadd.f32 %v2176_v53, %v3037_v20  ;;  %v2179_v52 = vadd.f32 %v2178_v57, %v2177_v55 }
 0x6cc   :  { %1699 = vst [vmem:[%s3175_s8 + $0xd0] sm:$0xff] %v1651_v49  ;;  %v1654_v58 = vadd.f32 %v2179_v52, %v3037_v20 }
 0x6ce   :  { %1700 = vst [vmem:[%s3175_s8 + $0xd8] sm:$0xff] %v1654_v58  ;;  %v2180_v59 = vpop.f32.mrb[136].mxu1 }
 0x6cf   :  { %v2181_v7 = vpop.f32.mrb[137].mxu1 }
 0x6d0   :  { %v2182_v61 = vadd.f32 %v2181_v7, %v2180_v59  ;;  %v2183_v54 = vpop.f32.mrb[138].mxu1 }
 0x6d1   :  { %v2184_v56 = vpop.f32.mrb[139].mxu1 }
 0x6d2   :  { %v1659_v51 = vadd.f32 %v2182_v61, %v3037_v20  ;;  %v2185_v60 = vadd.f32 %v2184_v56, %v2183_v54 }
 0x6d4   :  { %1701 = vst [vmem:[%s3175_s8 + $0xe0] sm:$0xff] %v1659_v51  ;;  %v1662_v25 = vadd.f32 %v2185_v60, %v3037_v20 }
 0x6d6   :  { %1702 = vst [vmem:[%s3175_s8 + $0xe8] sm:$0xff] %v1662_v25  ;;  %v2186_v11 = vpop.f32.mrb[140].mxu1 }
 0x6d7   :  { %v2187_v17 = vpop.f32.mrb[141].mxu1 }
 0x6d8   :  { %v2188_v12 = vadd.f32 %v2187_v17, %v2186_v11  ;;  %v2189_v13 = vpop.f32.mrb[142].mxu1 }
 0x6d9   :  { %v2190_v14 = vpop.f32.mrb[143].mxu1 }
 0x6da   :  { %v1667_v18 = vadd.f32 %v2188_v12, %v3037_v20  ;;  %v2191_v19 = vadd.f32 %v2190_v14, %v2189_v13 }
 0x6dc   :  { %1703 = vst [vmem:[%s3175_s8 + $0xf0] sm:$0xff] %v1667_v18  ;;  %v1670_v21 = vadd.f32 %v2191_v19, %v3037_v20 }
 0x6de   :  { %1704 = vst [vmem:[%s3175_s8 + $0xf8] sm:$0xff] %v1670_v21 }

</bundles_post_ra>
